<compile_context>
chip_gen: v5e
topology: v5e:2x2
jax: 0.10.0
libtpu: 0.0.40
codegen_flags: <defaults>
</compile_context>

<pallas_src>
import functools
import numpy as np
import jax
import jax.numpy as jnp
from jax.experimental import pallas as pl
from jax.experimental.pallas import tpu as pltpu


# ----------------------------------------------------------------------------
# Fused CLIP text-encoder kernel (one grid step per batch element)
# ----------------------------------------------------------------------------
def _clip_text_kernel(tokens_ref, eot_ref, tok_emb_ref, pos_emb_ref,
                      ln1_g_ref, ln1_b_ref, qkv_w_ref, qkv_b_ref,
                      out_w_ref, out_b_ref, ln2_g_ref, ln2_b_ref,
                      fc_w_ref, fc_b_ref, cp_w_ref, cp_b_ref,
                      lnf_g_ref, lnf_b_ref, proj_ref, o_ref,
                      *, layers, heads, normalize, eps=1e-5):
    L, D = pos_emb_ref.shape
    V = tok_emb_ref.shape[0]
    Dh = D // heads
    scale = 1.0 / float(np.sqrt(Dh))

    # --- token embedding via in-kernel one-hot matmul + positional embedding ---
    tok = tokens_ref[0]                                            # (L, 1) int32
    vocab_iota = jax.lax.broadcasted_iota(jnp.int32, (L, V), 1)    # (L, V)
    onehot = (vocab_iota == tok).astype(jnp.float32)               # (L, V)
    x = jnp.dot(onehot, tok_emb_ref[...], preferred_element_type=jnp.float32)
    x = x + pos_emb_ref[...]                                       # (L, D)

    # --- additive causal mask (CLIP build_attention_mask) ---
    row = jax.lax.broadcasted_iota(jnp.int32, (L, L), 0)
    col = jax.lax.broadcasted_iota(jnp.int32, (L, L), 1)
    causal = jnp.where(col <= row, 0.0, -1e30)

    def layer_norm(v, g, b):
        mu = jnp.mean(v, axis=-1, keepdims=True)
        vc = v - mu
        var = jnp.mean(vc * vc, axis=-1, keepdims=True)
        return vc * jax.lax.rsqrt(var + eps) * g + b

    # static unroll: whole transformer stack stays resident in VMEM/vregs
    for l in range(layers):
        # ---- multi-head self-attention (residual folded in) ----
        h = layer_norm(x, ln1_g_ref[l], ln1_b_ref[l])
        qkv = jnp.dot(h, qkv_w_ref[l],
                      preferred_element_type=jnp.float32) + qkv_b_ref[l]   # (L, 3D)
        w_out = out_w_ref[l]                                               # (D, D)
        attn = jnp.zeros((L, D), jnp.float32)
        for hh in range(heads):                     # static unroll over heads
            q = qkv[:, hh * Dh:(hh + 1) * Dh]
            k = qkv[:, D + hh * Dh:D + (hh + 1) * Dh]
            v = qkv[:, 2 * D + hh * Dh:2 * D + (hh + 1) * Dh]
            s = jax.lax.dot_general(q, k, (((1,), (1,)), ((), ())),
                                    preferred_element_type=jnp.float32) * scale
            s = s + causal
            m = jnp.max(s, axis=-1, keepdims=True)
            p = jnp.exp(s - m)
            p = p * pl.reciprocal(jnp.sum(p, axis=-1, keepdims=True), approx=True)
            o_h = jnp.dot(p, v, preferred_element_type=jnp.float32)        # (L, Dh)
            # fold head-concat + out-proj: accumulate o_h @ W_out[rows of head]
            attn = attn + jnp.dot(o_h, w_out[hh * Dh:(hh + 1) * Dh, :],
                                  preferred_element_type=jnp.float32)
        x = x + attn + out_b_ref[l]
        # ---- MLP with QuickGELU (residual folded in) ----
        h = layer_norm(x, ln2_g_ref[l], ln2_b_ref[l])
        m1 = jnp.dot(h, fc_w_ref[l],
                     preferred_element_type=jnp.float32) + fc_b_ref[l]
        m1 = m1 * jax.nn.sigmoid(1.702 * m1)        # QuickGELU
        x = x + jnp.dot(m1, cp_w_ref[l],
                        preferred_element_type=jnp.float32) + cp_b_ref[l]

    # ---- final LN, EOT pooling, text projection, L2 normalise ----
    x = layer_norm(x, lnf_g_ref[...], lnf_b_ref[...])
    pooled = jnp.dot(eot_ref[0], x, preferred_element_type=jnp.float32)     # (1, D)
    z = jnp.dot(pooled, proj_ref[...], preferred_element_type=jnp.float32)  # (1, out)
    if normalize:
        z = z * jax.lax.rsqrt(jnp.sum(z * z, axis=-1, keepdims=True))
    o_ref[0] = z


# ----------------------------------------------------------------------------
# Wrapper: builds the single pallas_call
# ----------------------------------------------------------------------------
def frozen_clip_text_embedder(tokens, params, cfg, normalize=True):
    B, L = tokens.shape
    V, D, out_dim = cfg["vocab"], cfg["width"], cfg["out_dim"]
    layers, heads = cfg["layers"], cfg["heads"]

    # EOT position = argmax over token ids (EOT has the highest id), as a
    # one-hot pooling vector -- tiny token preprocessing, same spirit as
    # clip.tokenize glue.
    eot_onehot = jax.nn.one_hot(jnp.argmax(tokens, axis=-1), L,
                                dtype=jnp.float32).reshape(B, 1, L)
    tokens3 = tokens.astype(jnp.int32).reshape(B, L, 1)

    def full(shape):
        nd = len(shape)
        return pl.BlockSpec(shape, lambda b, _nd=nd: (0,) * _nd)

    in_specs = [
        pl.BlockSpec((1, L, 1), lambda b: (b, 0, 0)),        # tokens
        pl.BlockSpec((1, 1, L), lambda b: (b, 0, 0)),        # eot one-hot
        full((V, D)),                                        # token_embedding
        full((L, D)),                                        # positional_embedding
        full((layers, 1, D)), full((layers, 1, D)),          # ln1 g / b
        full((layers, D, 3 * D)), full((layers, 1, 3 * D)),  # qkv w / b
        full((layers, D, D)), full((layers, 1, D)),          # out-proj w / b
        full((layers, 1, D)), full((layers, 1, D)),          # ln2 g / b
        full((layers, D, 4 * D)), full((layers, 1, 4 * D)),  # fc w / b
        full((layers, 4 * D, D)), full((layers, 1, D)),      # c_proj w / b
        full((1, D)), full((1, D)),                          # ln_final g / b
        full((D, out_dim)),                                  # text_projection
    ]
    out_spec = pl.BlockSpec((1, 1, out_dim), lambda b: (b, 0, 0))

    kernel = functools.partial(_clip_text_kernel, layers=layers, heads=heads,
                               normalize=normalize)

    z = pl.pallas_call(
        kernel,
        out_shape=jax.ShapeDtypeStruct((B, 1, out_dim), jnp.float32),
        grid=(B,),
        in_specs=in_specs,
        out_specs=out_spec,
        compiler_params=pltpu.CompilerParams(dimension_semantics=("parallel",)),
    )(tokens3, eot_onehot,
      params["token_embedding"], params["positional_embedding"],
      params["ln1_g"], params["ln1_b"],
      params["qkv_w"], params["qkv_b"],
      params["out_w"], params["out_b"],
      params["ln2_g"], params["ln2_b"],
      params["fc_w"], params["fc_b"],
      params["cp_w"], params["cp_b"],
      params["lnf_g"], params["lnf_b"],
      params["text_projection"])
    return z.reshape(B, out_dim)


# ----------------------------------------------------------------------------
# Deterministic synthetic parameters (CLIP text-tower architecture)
# ----------------------------------------------------------------------------
def init_params(key, cfg):
    # TODO(synk): real CLIP ViT-L/14 checkpoint weights are not loaded;
    # architecture-faithful deterministic random weights are used instead.
    V, L, D = cfg["vocab"], cfg["context"], cfg["width"]
    out_dim, layers = cfg["out_dim"], cfg["layers"]
    keys = iter(jax.random.split(key, 4 + 6 * layers))

    def nrm(shape, std=0.02):
        return jax.random.normal(next(keys), shape, jnp.float32) * std

    ones = lambda s: jnp.ones(s, jnp.float32)
    zeros = lambda s: jnp.zeros(s, jnp.float32)

    blocks = {k: [] for k in ("ln1_g", "ln1_b", "qkv_w", "qkv_b", "out_w",
                              "out_b", "ln2_g", "ln2_b", "fc_w", "fc_b",
                              "cp_w", "cp_b")}
    for _ in range(layers):
        blocks["ln1_g"].append(ones((1, D)));      blocks["ln1_b"].append(zeros((1, D)))
        blocks["qkv_w"].append(nrm((D, 3 * D)));   blocks["qkv_b"].append(zeros((1, 3 * D)))
        blocks["out_w"].append(nrm((D, D)));       blocks["out_b"].append(zeros((1, D)))
        blocks["ln2_g"].append(ones((1, D)));      blocks["ln2_b"].append(zeros((1, D)))
        blocks["fc_w"].append(nrm((D, 4 * D)));    blocks["fc_b"].append(zeros((1, 4 * D)))
        blocks["cp_w"].append(nrm((4 * D, D)));    blocks["cp_b"].append(zeros((1, D)))

    p = dict(
        token_embedding=nrm((V, D)),
        positional_embedding=nrm((L, D)),
        lnf_g=ones((1, D)), lnf_b=zeros((1, D)),
        text_projection=nrm((D, out_dim)),
    )
    for k, v in blocks.items():
        p[k] = jnp.stack(v, axis=0)
    return p


def make_tokens(key, batch, cfg):
    """CLIP-style token ids: [SOT, text..., EOT, 0-padding]; EOT is max id."""
    V, L = cfg["vocab"], cfg["context"]
    sot, eot = V - 2, V - 1
    body = np.asarray(jax.random.randint(key, (batch, L), 1, sot), np.int32)
    toks = np.zeros((batch, L), np.int32)
    toks[:, 0] = sot
    for b in range(batch):
        n = max(1, (b * 3 + 5) % (L - 2))
        toks[b, 1:1 + n] = body[b, :n]
        toks[b, 1 + n] = eot
    return jnp.asarray(toks)


if __name__ == "__main__":
    # TODO(synk): clip.tokenize (host-side BPE string tokenization) has no
    # Pallas equivalent; pre-tokenized int32 ids are the kernel input.
    cfg = dict(vocab=64, context=16, width=32, heads=4, layers=2, out_dim=16)
    key = jax.random.PRNGKey(0)
    pkey, tkey = jax.random.split(key)
    params = init_params(pkey, cfg)
    tokens = make_tokens(tkey, batch=2, cfg=cfg)          # (2, 16) int32

    z = frozen_clip_text_embedder(tokens, params, cfg, normalize=True)
    jax.block_until_ready(z)

    assert z.shape == (2, cfg["out_dim"]) and z.dtype == jnp.float32
    norms = jnp.linalg.norm(z, axis=-1)
    assert bool(jnp.all(jnp.abs(norms - 1.0) < 1e-3))     # normalize=True path
    print("KERNEL_OK")
</pallas_src>

<mosaic_0001>
module attributes {stable_mosaic.version = 11 : i64} {
  func.func @_clip_text_kernel(%arg0: i32, %arg1: memref<1x16x1xi32, #tpu.memory_space<vmem>>, %arg2: memref<1x1x16xf32, #tpu.memory_space<vmem>>, %arg3: memref<64x32xf32, #tpu.memory_space<vmem>>, %arg4: memref<16x32xf32, #tpu.memory_space<vmem>>, %arg5: memref<2x1x32xf32, #tpu.memory_space<vmem>>, %arg6: memref<2x1x32xf32, #tpu.memory_space<vmem>>, %arg7: memref<2x32x96xf32, #tpu.memory_space<vmem>>, %arg8: memref<2x1x96xf32, #tpu.memory_space<vmem>>, %arg9: memref<2x32x32xf32, #tpu.memory_space<vmem>>, %arg10: memref<2x1x32xf32, #tpu.memory_space<vmem>>, %arg11: memref<2x1x32xf32, #tpu.memory_space<vmem>>, %arg12: memref<2x1x32xf32, #tpu.memory_space<vmem>>, %arg13: memref<2x32x128xf32, #tpu.memory_space<vmem>>, %arg14: memref<2x1x128xf32, #tpu.memory_space<vmem>>, %arg15: memref<2x128x32xf32, #tpu.memory_space<vmem>>, %arg16: memref<2x1x32xf32, #tpu.memory_space<vmem>>, %arg17: memref<1x32xf32, #tpu.memory_space<vmem>>, %arg18: memref<1x32xf32, #tpu.memory_space<vmem>>, %arg19: memref<32x16xf32, #tpu.memory_space<vmem>>, %arg20: memref<1x1x16xf32, #tpu.memory_space<vmem>>) attributes {dimension_semantics = [#tpu.dimension_semantics<parallel>], iteration_bounds = array<i64: 2>, scalar_prefetch = 0 : i64, scratch_operands = 0 : i64, tpu.core_type = #tpu.core_type<tc>, window_params = [{transform_indices = @transform_0, window_bounds = array<i64: 1, 16, 1>}, {transform_indices = @transform_1, window_bounds = array<i64: 1, 1, 16>}, {pipeline_mode = #tpu.pipeline_mode<synchronous>, transform_indices = @transform_2, window_bounds = array<i64: 64, 32>}, {pipeline_mode = #tpu.pipeline_mode<synchronous>, transform_indices = @transform_3, window_bounds = array<i64: 16, 32>}, {pipeline_mode = #tpu.pipeline_mode<synchronous>, transform_indices = @transform_4, window_bounds = array<i64: 2, 1, 32>}, {pipeline_mode = #tpu.pipeline_mode<synchronous>, transform_indices = @transform_5, window_bounds = array<i64: 2, 1, 32>}, {pipeline_mode = #tpu.pipeline_mode<synchronous>, transform_indices = @transform_6, window_bounds = array<i64: 2, 32, 96>}, {pipeline_mode = #tpu.pipeline_mode<synchronous>, transform_indices = @transform_7, window_bounds = array<i64: 2, 1, 96>}, {pipeline_mode = #tpu.pipeline_mode<synchronous>, transform_indices = @transform_8, window_bounds = array<i64: 2, 32, 32>}, {pipeline_mode = #tpu.pipeline_mode<synchronous>, transform_indices = @transform_9, window_bounds = array<i64: 2, 1, 32>}, {pipeline_mode = #tpu.pipeline_mode<synchronous>, transform_indices = @transform_10, window_bounds = array<i64: 2, 1, 32>}, {pipeline_mode = #tpu.pipeline_mode<synchronous>, transform_indices = @transform_11, window_bounds = array<i64: 2, 1, 32>}, {pipeline_mode = #tpu.pipeline_mode<synchronous>, transform_indices = @transform_12, window_bounds = array<i64: 2, 32, 128>}, {pipeline_mode = #tpu.pipeline_mode<synchronous>, transform_indices = @transform_13, window_bounds = array<i64: 2, 1, 128>}, {pipeline_mode = #tpu.pipeline_mode<synchronous>, transform_indices = @transform_14, window_bounds = array<i64: 2, 128, 32>}, {pipeline_mode = #tpu.pipeline_mode<synchronous>, transform_indices = @transform_15, window_bounds = array<i64: 2, 1, 32>}, {pipeline_mode = #tpu.pipeline_mode<synchronous>, transform_indices = @transform_16, window_bounds = array<i64: 1, 32>}, {pipeline_mode = #tpu.pipeline_mode<synchronous>, transform_indices = @transform_17, window_bounds = array<i64: 1, 32>}, {pipeline_mode = #tpu.pipeline_mode<synchronous>, transform_indices = @transform_18, window_bounds = array<i64: 32, 16>}, {transform_indices = @transform_19, window_bounds = array<i64: 1, 1, 16>}]} {
    %c0 = arith.constant 0 : index
    %c0_0 = arith.constant 0 : index
    %c0_1 = arith.constant 0 : index
    %0 = vector.load %arg1[%c0, %c0_0, %c0_1] : memref<1x16x1xi32, #tpu.memory_space<vmem>>, vector<1x16x1xi32>
    %1 = vector.shape_cast %0 : vector<1x16x1xi32> to vector<16x1xi32>
    %2 = tpu.iota {dimensions = array<i32: 1>} : vector<16x64xi32>
    %3 = vector.broadcast %1 : vector<16x1xi32> to vector<16x64xi32>
    %4 = arith.cmpi eq, %2, %3 : vector<16x64xi32>
    %5 = arith.extui %4 : vector<16x64xi1> to vector<16x64xi32>
    %6 = arith.sitofp %5 : vector<16x64xi32> to vector<16x64xf32>
    %c0_2 = arith.constant 0 : index
    %c0_3 = arith.constant 0 : index
    %7 = vector.load %arg3[%c0_2, %c0_3] : memref<64x32xf32, #tpu.memory_space<vmem>>, vector<64x32xf32>
    %cst = arith.constant dense<0.000000e+00> : vector<16x32xf32>
    %8 = tpu.matmul %6, %7, %cst {dimension_numbers = #tpu.dot_dimension_numbers<[1], [0], [0], [1], [0, 0, 1, 1], [], []>} : vector<16x64xf32>, vector<64x32xf32>, vector<16x32xf32> -> vector<16x32xf32>
    %c0_4 = arith.constant 0 : index
    %c0_5 = arith.constant 0 : index
    %9 = vector.load %arg4[%c0_4, %c0_5] : memref<16x32xf32, #tpu.memory_space<vmem>>, vector<16x32xf32>
    %10 = arith.addf %8, %9 : vector<16x32xf32>
    %11 = tpu.iota {dimensions = array<i32: 0>} : vector<16x16xi32>
    %12 = tpu.iota {dimensions = array<i32: 1>} : vector<16x16xi32>
    %13 = arith.cmpi sle, %12, %11 : vector<16x16xi32>
    %cst_6 = arith.constant 0.000000e+00 : f32
    %cst_7 = arith.constant -1.000000e+30 : f32
    %14 = vector.broadcast %cst_6 : f32 to vector<16x16xf32>
    %15 = vector.broadcast %cst_7 : f32 to vector<16x16xf32>
    %16 = arith.select %13, %14, %15 : vector<16x16xi1>, vector<16x16xf32>
    %c0_8 = arith.constant 0 : index
    %c0_9 = arith.constant 0 : index
    %c0_10 = arith.constant 0 : index
    %17 = vector.load %arg5[%c0_8, %c0_9, %c0_10] : memref<2x1x32xf32, #tpu.memory_space<vmem>>, vector<1x1x32xf32>
    %18 = vector.shape_cast %17 : vector<1x1x32xf32> to vector<1x32xf32>
    %c0_11 = arith.constant 0 : index
    %c0_12 = arith.constant 0 : index
    %c0_13 = arith.constant 0 : index
    %19 = vector.load %arg6[%c0_11, %c0_12, %c0_13] : memref<2x1x32xf32, #tpu.memory_space<vmem>>, vector<1x1x32xf32>
    %20 = vector.shape_cast %19 : vector<1x1x32xf32> to vector<1x32xf32>
    %cst_14 = arith.constant dense<0.000000e+00> : vector<16xf32>
    %21 = vector.multi_reduction <add>, %10, %cst_14 [1] : vector<16x32xf32> to vector<16xf32>
    %22 = vector.shape_cast %21 : vector<16xf32> to vector<16x1xf32>
    %cst_15 = arith.constant 3.200000e+01 : f32
    %23 = vector.broadcast %cst_15 : f32 to vector<16x1xf32>
    %24 = arith.divf %22, %23 : vector<16x1xf32>
    %25 = vector.broadcast %24 : vector<16x1xf32> to vector<16x32xf32>
    %26 = arith.subf %10, %25 : vector<16x32xf32>
    %27 = arith.mulf %26, %26 : vector<16x32xf32>
    %cst_16 = arith.constant dense<0.000000e+00> : vector<16xf32>
    %28 = vector.multi_reduction <add>, %27, %cst_16 [1] : vector<16x32xf32> to vector<16xf32>
    %29 = vector.shape_cast %28 : vector<16xf32> to vector<16x1xf32>
    %cst_17 = arith.constant 3.200000e+01 : f32
    %30 = vector.broadcast %cst_17 : f32 to vector<16x1xf32>
    %31 = arith.divf %29, %30 : vector<16x1xf32>
    %cst_18 = arith.constant 9.99999974E-6 : f32
    %32 = vector.broadcast %cst_18 : f32 to vector<16x1xf32>
    %33 = arith.addf %31, %32 : vector<16x1xf32>
    %34 = math.rsqrt %33 : vector<16x1xf32>
    %35 = vector.broadcast %34 : vector<16x1xf32> to vector<16x32xf32>
    %36 = arith.mulf %26, %35 : vector<16x32xf32>
    %37 = vector.broadcast %18 : vector<1x32xf32> to vector<16x32xf32>
    %38 = arith.mulf %36, %37 : vector<16x32xf32>
    %39 = vector.broadcast %20 : vector<1x32xf32> to vector<16x32xf32>
    %40 = arith.addf %38, %39 : vector<16x32xf32>
    %c0_19 = arith.constant 0 : index
    %c0_20 = arith.constant 0 : index
    %c0_21 = arith.constant 0 : index
    %41 = vector.load %arg7[%c0_19, %c0_20, %c0_21] : memref<2x32x96xf32, #tpu.memory_space<vmem>>, vector<1x32x96xf32>
    %42 = vector.shape_cast %41 : vector<1x32x96xf32> to vector<32x96xf32>
    %cst_22 = arith.constant dense<0.000000e+00> : vector<16x96xf32>
    %43 = tpu.matmul %40, %42, %cst_22 {dimension_numbers = #tpu.dot_dimension_numbers<[1], [0], [0], [1], [0, 0, 1, 1], [], []>} : vector<16x32xf32>, vector<32x96xf32>, vector<16x96xf32> -> vector<16x96xf32>
    %c0_23 = arith.constant 0 : index
    %c0_24 = arith.constant 0 : index
    %c0_25 = arith.constant 0 : index
    %44 = vector.load %arg8[%c0_23, %c0_24, %c0_25] : memref<2x1x96xf32, #tpu.memory_space<vmem>>, vector<1x1x96xf32>
    %45 = vector.shape_cast %44 : vector<1x1x96xf32> to vector<1x96xf32>
    %46 = vector.broadcast %45 : vector<1x96xf32> to vector<16x96xf32>
    %47 = arith.addf %43, %46 : vector<16x96xf32>
    %c0_26 = arith.constant 0 : index
    %c0_27 = arith.constant 0 : index
    %c0_28 = arith.constant 0 : index
    %48 = vector.load %arg9[%c0_26, %c0_27, %c0_28] : memref<2x32x32xf32, #tpu.memory_space<vmem>>, vector<1x32x32xf32>
    %49 = vector.shape_cast %48 : vector<1x32x32xf32> to vector<32x32xf32>
    %cst_29 = arith.constant 0.000000e+00 : f32
    %50 = vector.broadcast %cst_29 : f32 to vector<16x32xf32>
    %51 = vector.extract_strided_slice %47 {offsets = [0, 0], sizes = [16, 8], strides = [1, 1]} : vector<16x96xf32> to vector<16x8xf32>
    %52 = vector.extract_strided_slice %47 {offsets = [0, 32], sizes = [16, 8], strides = [1, 1]} : vector<16x96xf32> to vector<16x8xf32>
    %53 = vector.extract_strided_slice %47 {offsets = [0, 64], sizes = [16, 8], strides = [1, 1]} : vector<16x96xf32> to vector<16x8xf32>
    %cst_30 = arith.constant dense<0.000000e+00> : vector<16x16xf32>
    %54 = tpu.matmul %51, %52, %cst_30 {dimension_numbers = #tpu.dot_dimension_numbers<[1], [1], [0], [0], [0, 0, 1, 0], [], []>} : vector<16x8xf32>, vector<16x8xf32>, vector<16x16xf32> -> vector<16x16xf32>
    %cst_31 = arith.constant 0.353553385 : f32
    %55 = vector.broadcast %cst_31 : f32 to vector<16x16xf32>
    %56 = arith.mulf %54, %55 : vector<16x16xf32>
    %57 = arith.addf %56, %16 : vector<16x16xf32>
    %cst_32 = arith.constant dense<0xFF800000> : vector<16xf32>
    %58 = vector.multi_reduction <maximumf>, %57, %cst_32 [1] : vector<16x16xf32> to vector<16xf32>
    %59 = vector.shape_cast %58 : vector<16xf32> to vector<16x1xf32>
    %60 = vector.broadcast %59 : vector<16x1xf32> to vector<16x16xf32>
    %61 = arith.subf %57, %60 : vector<16x16xf32>
    %62 = math.exp %61 : vector<16x16xf32>
    %cst_33 = arith.constant dense<0.000000e+00> : vector<16xf32>
    %63 = vector.multi_reduction <add>, %62, %cst_33 [1] : vector<16x16xf32> to vector<16xf32>
    %64 = vector.shape_cast %63 : vector<16xf32> to vector<16x1xf32>
    %65 = tpu.reciprocal %64 {approx = true} : vector<16x1xf32> -> vector<16x1xf32>
    %66 = vector.broadcast %65 : vector<16x1xf32> to vector<16x16xf32>
    %67 = arith.mulf %62, %66 : vector<16x16xf32>
    %cst_34 = arith.constant dense<0.000000e+00> : vector<16x8xf32>
    %68 = tpu.matmul %67, %53, %cst_34 {dimension_numbers = #tpu.dot_dimension_numbers<[1], [0], [0], [1], [0, 0, 1, 1], [], []>} : vector<16x16xf32>, vector<16x8xf32>, vector<16x8xf32> -> vector<16x8xf32>
    %69 = vector.extract_strided_slice %49 {offsets = [0, 0], sizes = [8, 32], strides = [1, 1]} : vector<32x32xf32> to vector<8x32xf32>
    %cst_35 = arith.constant dense<0.000000e+00> : vector<16x32xf32>
    %70 = tpu.matmul %68, %69, %cst_35 {dimension_numbers = #tpu.dot_dimension_numbers<[1], [0], [0], [1], [0, 0, 1, 1], [], []>} : vector<16x8xf32>, vector<8x32xf32>, vector<16x32xf32> -> vector<16x32xf32>
    %71 = arith.addf %50, %70 : vector<16x32xf32>
    %72 = vector.extract_strided_slice %47 {offsets = [0, 8], sizes = [16, 8], strides = [1, 1]} : vector<16x96xf32> to vector<16x8xf32>
    %73 = vector.extract_strided_slice %47 {offsets = [0, 40], sizes = [16, 8], strides = [1, 1]} : vector<16x96xf32> to vector<16x8xf32>
    %74 = vector.extract_strided_slice %47 {offsets = [0, 72], sizes = [16, 8], strides = [1, 1]} : vector<16x96xf32> to vector<16x8xf32>
    %cst_36 = arith.constant dense<0.000000e+00> : vector<16x16xf32>
    %75 = tpu.matmul %72, %73, %cst_36 {dimension_numbers = #tpu.dot_dimension_numbers<[1], [1], [0], [0], [0, 0, 1, 0], [], []>} : vector<16x8xf32>, vector<16x8xf32>, vector<16x16xf32> -> vector<16x16xf32>
    %cst_37 = arith.constant 0.353553385 : f32
    %76 = vector.broadcast %cst_37 : f32 to vector<16x16xf32>
    %77 = arith.mulf %75, %76 : vector<16x16xf32>
    %78 = arith.addf %77, %16 : vector<16x16xf32>
    %cst_38 = arith.constant dense<0xFF800000> : vector<16xf32>
    %79 = vector.multi_reduction <maximumf>, %78, %cst_38 [1] : vector<16x16xf32> to vector<16xf32>
    %80 = vector.shape_cast %79 : vector<16xf32> to vector<16x1xf32>
    %81 = vector.broadcast %80 : vector<16x1xf32> to vector<16x16xf32>
    %82 = arith.subf %78, %81 : vector<16x16xf32>
    %83 = math.exp %82 : vector<16x16xf32>
    %cst_39 = arith.constant dense<0.000000e+00> : vector<16xf32>
    %84 = vector.multi_reduction <add>, %83, %cst_39 [1] : vector<16x16xf32> to vector<16xf32>
    %85 = vector.shape_cast %84 : vector<16xf32> to vector<16x1xf32>
    %86 = tpu.reciprocal %85 {approx = true} : vector<16x1xf32> -> vector<16x1xf32>
    %87 = vector.broadcast %86 : vector<16x1xf32> to vector<16x16xf32>
    %88 = arith.mulf %83, %87 : vector<16x16xf32>
    %cst_40 = arith.constant dense<0.000000e+00> : vector<16x8xf32>
    %89 = tpu.matmul %88, %74, %cst_40 {dimension_numbers = #tpu.dot_dimension_numbers<[1], [0], [0], [1], [0, 0, 1, 1], [], []>} : vector<16x16xf32>, vector<16x8xf32>, vector<16x8xf32> -> vector<16x8xf32>
    %90 = vector.extract_strided_slice %49 {offsets = [8, 0], sizes = [8, 32], strides = [1, 1]} : vector<32x32xf32> to vector<8x32xf32>
    %cst_41 = arith.constant dense<0.000000e+00> : vector<16x32xf32>
    %91 = tpu.matmul %89, %90, %cst_41 {dimension_numbers = #tpu.dot_dimension_numbers<[1], [0], [0], [1], [0, 0, 1, 1], [], []>} : vector<16x8xf32>, vector<8x32xf32>, vector<16x32xf32> -> vector<16x32xf32>
    %92 = arith.addf %71, %91 : vector<16x32xf32>
    %93 = vector.extract_strided_slice %47 {offsets = [0, 16], sizes = [16, 8], strides = [1, 1]} : vector<16x96xf32> to vector<16x8xf32>
    %94 = vector.extract_strided_slice %47 {offsets = [0, 48], sizes = [16, 8], strides = [1, 1]} : vector<16x96xf32> to vector<16x8xf32>
    %95 = vector.extract_strided_slice %47 {offsets = [0, 80], sizes = [16, 8], strides = [1, 1]} : vector<16x96xf32> to vector<16x8xf32>
    %cst_42 = arith.constant dense<0.000000e+00> : vector<16x16xf32>
    %96 = tpu.matmul %93, %94, %cst_42 {dimension_numbers = #tpu.dot_dimension_numbers<[1], [1], [0], [0], [0, 0, 1, 0], [], []>} : vector<16x8xf32>, vector<16x8xf32>, vector<16x16xf32> -> vector<16x16xf32>
    %cst_43 = arith.constant 0.353553385 : f32
    %97 = vector.broadcast %cst_43 : f32 to vector<16x16xf32>
    %98 = arith.mulf %96, %97 : vector<16x16xf32>
    %99 = arith.addf %98, %16 : vector<16x16xf32>
    %cst_44 = arith.constant dense<0xFF800000> : vector<16xf32>
    %100 = vector.multi_reduction <maximumf>, %99, %cst_44 [1] : vector<16x16xf32> to vector<16xf32>
    %101 = vector.shape_cast %100 : vector<16xf32> to vector<16x1xf32>
    %102 = vector.broadcast %101 : vector<16x1xf32> to vector<16x16xf32>
    %103 = arith.subf %99, %102 : vector<16x16xf32>
    %104 = math.exp %103 : vector<16x16xf32>
    %cst_45 = arith.constant dense<0.000000e+00> : vector<16xf32>
    %105 = vector.multi_reduction <add>, %104, %cst_45 [1] : vector<16x16xf32> to vector<16xf32>
    %106 = vector.shape_cast %105 : vector<16xf32> to vector<16x1xf32>
    %107 = tpu.reciprocal %106 {approx = true} : vector<16x1xf32> -> vector<16x1xf32>
    %108 = vector.broadcast %107 : vector<16x1xf32> to vector<16x16xf32>
    %109 = arith.mulf %104, %108 : vector<16x16xf32>
    %cst_46 = arith.constant dense<0.000000e+00> : vector<16x8xf32>
    %110 = tpu.matmul %109, %95, %cst_46 {dimension_numbers = #tpu.dot_dimension_numbers<[1], [0], [0], [1], [0, 0, 1, 1], [], []>} : vector<16x16xf32>, vector<16x8xf32>, vector<16x8xf32> -> vector<16x8xf32>
    %111 = vector.extract_strided_slice %49 {offsets = [16, 0], sizes = [8, 32], strides = [1, 1]} : vector<32x32xf32> to vector<8x32xf32>
    %cst_47 = arith.constant dense<0.000000e+00> : vector<16x32xf32>
    %112 = tpu.matmul %110, %111, %cst_47 {dimension_numbers = #tpu.dot_dimension_numbers<[1], [0], [0], [1], [0, 0, 1, 1], [], []>} : vector<16x8xf32>, vector<8x32xf32>, vector<16x32xf32> -> vector<16x32xf32>
    %113 = arith.addf %92, %112 : vector<16x32xf32>
    %114 = vector.extract_strided_slice %47 {offsets = [0, 24], sizes = [16, 8], strides = [1, 1]} : vector<16x96xf32> to vector<16x8xf32>
    %115 = vector.extract_strided_slice %47 {offsets = [0, 56], sizes = [16, 8], strides = [1, 1]} : vector<16x96xf32> to vector<16x8xf32>
    %116 = vector.extract_strided_slice %47 {offsets = [0, 88], sizes = [16, 8], strides = [1, 1]} : vector<16x96xf32> to vector<16x8xf32>
    %cst_48 = arith.constant dense<0.000000e+00> : vector<16x16xf32>
    %117 = tpu.matmul %114, %115, %cst_48 {dimension_numbers = #tpu.dot_dimension_numbers<[1], [1], [0], [0], [0, 0, 1, 0], [], []>} : vector<16x8xf32>, vector<16x8xf32>, vector<16x16xf32> -> vector<16x16xf32>
    %cst_49 = arith.constant 0.353553385 : f32
    %118 = vector.broadcast %cst_49 : f32 to vector<16x16xf32>
    %119 = arith.mulf %117, %118 : vector<16x16xf32>
    %120 = arith.addf %119, %16 : vector<16x16xf32>
    %cst_50 = arith.constant dense<0xFF800000> : vector<16xf32>
    %121 = vector.multi_reduction <maximumf>, %120, %cst_50 [1] : vector<16x16xf32> to vector<16xf32>
    %122 = vector.shape_cast %121 : vector<16xf32> to vector<16x1xf32>
    %123 = vector.broadcast %122 : vector<16x1xf32> to vector<16x16xf32>
    %124 = arith.subf %120, %123 : vector<16x16xf32>
    %125 = math.exp %124 : vector<16x16xf32>
    %cst_51 = arith.constant dense<0.000000e+00> : vector<16xf32>
    %126 = vector.multi_reduction <add>, %125, %cst_51 [1] : vector<16x16xf32> to vector<16xf32>
    %127 = vector.shape_cast %126 : vector<16xf32> to vector<16x1xf32>
    %128 = tpu.reciprocal %127 {approx = true} : vector<16x1xf32> -> vector<16x1xf32>
    %129 = vector.broadcast %128 : vector<16x1xf32> to vector<16x16xf32>
    %130 = arith.mulf %125, %129 : vector<16x16xf32>
    %cst_52 = arith.constant dense<0.000000e+00> : vector<16x8xf32>
    %131 = tpu.matmul %130, %116, %cst_52 {dimension_numbers = #tpu.dot_dimension_numbers<[1], [0], [0], [1], [0, 0, 1, 1], [], []>} : vector<16x16xf32>, vector<16x8xf32>, vector<16x8xf32> -> vector<16x8xf32>
    %132 = vector.extract_strided_slice %49 {offsets = [24, 0], sizes = [8, 32], strides = [1, 1]} : vector<32x32xf32> to vector<8x32xf32>
    %cst_53 = arith.constant dense<0.000000e+00> : vector<16x32xf32>
    %133 = tpu.matmul %131, %132, %cst_53 {dimension_numbers = #tpu.dot_dimension_numbers<[1], [0], [0], [1], [0, 0, 1, 1], [], []>} : vector<16x8xf32>, vector<8x32xf32>, vector<16x32xf32> -> vector<16x32xf32>
    %134 = arith.addf %113, %133 : vector<16x32xf32>
    %135 = arith.addf %10, %134 : vector<16x32xf32>
    %c0_54 = arith.constant 0 : index
    %c0_55 = arith.constant 0 : index
    %c0_56 = arith.constant 0 : index
    %136 = vector.load %arg10[%c0_54, %c0_55, %c0_56] : memref<2x1x32xf32, #tpu.memory_space<vmem>>, vector<1x1x32xf32>
    %137 = vector.shape_cast %136 : vector<1x1x32xf32> to vector<1x32xf32>
    %138 = vector.broadcast %137 : vector<1x32xf32> to vector<16x32xf32>
    %139 = arith.addf %135, %138 : vector<16x32xf32>
    %c0_57 = arith.constant 0 : index
    %c0_58 = arith.constant 0 : index
    %c0_59 = arith.constant 0 : index
    %140 = vector.load %arg11[%c0_57, %c0_58, %c0_59] : memref<2x1x32xf32, #tpu.memory_space<vmem>>, vector<1x1x32xf32>
    %141 = vector.shape_cast %140 : vector<1x1x32xf32> to vector<1x32xf32>
    %c0_60 = arith.constant 0 : index
    %c0_61 = arith.constant 0 : index
    %c0_62 = arith.constant 0 : index
    %142 = vector.load %arg12[%c0_60, %c0_61, %c0_62] : memref<2x1x32xf32, #tpu.memory_space<vmem>>, vector<1x1x32xf32>
    %143 = vector.shape_cast %142 : vector<1x1x32xf32> to vector<1x32xf32>
    %cst_63 = arith.constant dense<0.000000e+00> : vector<16xf32>
    %144 = vector.multi_reduction <add>, %139, %cst_63 [1] : vector<16x32xf32> to vector<16xf32>
    %145 = vector.shape_cast %144 : vector<16xf32> to vector<16x1xf32>
    %cst_64 = arith.constant 3.200000e+01 : f32
    %146 = vector.broadcast %cst_64 : f32 to vector<16x1xf32>
    %147 = arith.divf %145, %146 : vector<16x1xf32>
    %148 = vector.broadcast %147 : vector<16x1xf32> to vector<16x32xf32>
    %149 = arith.subf %139, %148 : vector<16x32xf32>
    %150 = arith.mulf %149, %149 : vector<16x32xf32>
    %cst_65 = arith.constant dense<0.000000e+00> : vector<16xf32>
    %151 = vector.multi_reduction <add>, %150, %cst_65 [1] : vector<16x32xf32> to vector<16xf32>
    %152 = vector.shape_cast %151 : vector<16xf32> to vector<16x1xf32>
    %cst_66 = arith.constant 3.200000e+01 : f32
    %153 = vector.broadcast %cst_66 : f32 to vector<16x1xf32>
    %154 = arith.divf %152, %153 : vector<16x1xf32>
    %cst_67 = arith.constant 9.99999974E-6 : f32
    %155 = vector.broadcast %cst_67 : f32 to vector<16x1xf32>
    %156 = arith.addf %154, %155 : vector<16x1xf32>
    %157 = math.rsqrt %156 : vector<16x1xf32>
    %158 = vector.broadcast %157 : vector<16x1xf32> to vector<16x32xf32>
    %159 = arith.mulf %149, %158 : vector<16x32xf32>
    %160 = vector.broadcast %141 : vector<1x32xf32> to vector<16x32xf32>
    %161 = arith.mulf %159, %160 : vector<16x32xf32>
    %162 = vector.broadcast %143 : vector<1x32xf32> to vector<16x32xf32>
    %163 = arith.addf %161, %162 : vector<16x32xf32>
    %c0_68 = arith.constant 0 : index
    %c0_69 = arith.constant 0 : index
    %c0_70 = arith.constant 0 : index
    %164 = vector.load %arg13[%c0_68, %c0_69, %c0_70] : memref<2x32x128xf32, #tpu.memory_space<vmem>>, vector<1x32x128xf32>
    %165 = vector.shape_cast %164 : vector<1x32x128xf32> to vector<32x128xf32>
    %cst_71 = arith.constant dense<0.000000e+00> : vector<16x128xf32>
    %166 = tpu.matmul %163, %165, %cst_71 {dimension_numbers = #tpu.dot_dimension_numbers<[1], [0], [0], [1], [0, 0, 1, 1], [], []>} : vector<16x32xf32>, vector<32x128xf32>, vector<16x128xf32> -> vector<16x128xf32>
    %c0_72 = arith.constant 0 : index
    %c0_73 = arith.constant 0 : index
    %c0_74 = arith.constant 0 : index
    %167 = vector.load %arg14[%c0_72, %c0_73, %c0_74] : memref<2x1x128xf32, #tpu.memory_space<vmem>>, vector<1x1x128xf32>
    %168 = vector.shape_cast %167 : vector<1x1x128xf32> to vector<1x128xf32>
    %169 = vector.broadcast %168 : vector<1x128xf32> to vector<16x128xf32>
    %170 = arith.addf %166, %169 : vector<16x128xf32>
    %cst_75 = arith.constant 1.702000e+00 : f32
    %171 = vector.broadcast %cst_75 : f32 to vector<16x128xf32>
    %172 = arith.mulf %171, %170 : vector<16x128xf32>
    %173 = arith.negf %172 : vector<16x128xf32>
    %174 = math.exp %173 : vector<16x128xf32>
    %cst_76 = arith.constant 1.000000e+00 : f32
    %175 = vector.broadcast %cst_76 : f32 to vector<16x128xf32>
    %176 = arith.addf %175, %174 : vector<16x128xf32>
    %177 = arith.divf %175, %176 : vector<16x128xf32>
    %178 = arith.mulf %170, %177 : vector<16x128xf32>
    %c0_77 = arith.constant 0 : index
    %c0_78 = arith.constant 0 : index
    %c0_79 = arith.constant 0 : index
    %179 = vector.load %arg15[%c0_77, %c0_78, %c0_79] : memref<2x128x32xf32, #tpu.memory_space<vmem>>, vector<1x128x32xf32>
    %180 = vector.shape_cast %179 : vector<1x128x32xf32> to vector<128x32xf32>
    %cst_80 = arith.constant dense<0.000000e+00> : vector<16x32xf32>
    %181 = tpu.matmul %178, %180, %cst_80 {dimension_numbers = #tpu.dot_dimension_numbers<[1], [0], [0], [1], [0, 0, 1, 1], [], []>} : vector<16x128xf32>, vector<128x32xf32>, vector<16x32xf32> -> vector<16x32xf32>
    %182 = arith.addf %139, %181 : vector<16x32xf32>
    %c0_81 = arith.constant 0 : index
    %c0_82 = arith.constant 0 : index
    %c0_83 = arith.constant 0 : index
    %183 = vector.load %arg16[%c0_81, %c0_82, %c0_83] : memref<2x1x32xf32, #tpu.memory_space<vmem>>, vector<1x1x32xf32>
    %184 = vector.shape_cast %183 : vector<1x1x32xf32> to vector<1x32xf32>
    %185 = vector.broadcast %184 : vector<1x32xf32> to vector<16x32xf32>
    %186 = arith.addf %182, %185 : vector<16x32xf32>
    %c1 = arith.constant 1 : index
    %c0_84 = arith.constant 0 : index
    %c0_85 = arith.constant 0 : index
    %187 = vector.load %arg5[%c1, %c0_84, %c0_85] : memref<2x1x32xf32, #tpu.memory_space<vmem>>, vector<1x1x32xf32>
    %188 = vector.shape_cast %187 : vector<1x1x32xf32> to vector<1x32xf32>
    %c1_86 = arith.constant 1 : index
    %c0_87 = arith.constant 0 : index
    %c0_88 = arith.constant 0 : index
    %189 = vector.load %arg6[%c1_86, %c0_87, %c0_88] : memref<2x1x32xf32, #tpu.memory_space<vmem>>, vector<1x1x32xf32>
    %190 = vector.shape_cast %189 : vector<1x1x32xf32> to vector<1x32xf32>
    %cst_89 = arith.constant dense<0.000000e+00> : vector<16xf32>
    %191 = vector.multi_reduction <add>, %186, %cst_89 [1] : vector<16x32xf32> to vector<16xf32>
    %192 = vector.shape_cast %191 : vector<16xf32> to vector<16x1xf32>
    %cst_90 = arith.constant 3.200000e+01 : f32
    %193 = vector.broadcast %cst_90 : f32 to vector<16x1xf32>
    %194 = arith.divf %192, %193 : vector<16x1xf32>
    %195 = vector.broadcast %194 : vector<16x1xf32> to vector<16x32xf32>
    %196 = arith.subf %186, %195 : vector<16x32xf32>
    %197 = arith.mulf %196, %196 : vector<16x32xf32>
    %cst_91 = arith.constant dense<0.000000e+00> : vector<16xf32>
    %198 = vector.multi_reduction <add>, %197, %cst_91 [1] : vector<16x32xf32> to vector<16xf32>
    %199 = vector.shape_cast %198 : vector<16xf32> to vector<16x1xf32>
    %cst_92 = arith.constant 3.200000e+01 : f32
    %200 = vector.broadcast %cst_92 : f32 to vector<16x1xf32>
    %201 = arith.divf %199, %200 : vector<16x1xf32>
    %cst_93 = arith.constant 9.99999974E-6 : f32
    %202 = vector.broadcast %cst_93 : f32 to vector<16x1xf32>
    %203 = arith.addf %201, %202 : vector<16x1xf32>
    %204 = math.rsqrt %203 : vector<16x1xf32>
    %205 = vector.broadcast %204 : vector<16x1xf32> to vector<16x32xf32>
    %206 = arith.mulf %196, %205 : vector<16x32xf32>
    %207 = vector.broadcast %188 : vector<1x32xf32> to vector<16x32xf32>
    %208 = arith.mulf %206, %207 : vector<16x32xf32>
    %209 = vector.broadcast %190 : vector<1x32xf32> to vector<16x32xf32>
    %210 = arith.addf %208, %209 : vector<16x32xf32>
    %c1_94 = arith.constant 1 : index
    %c0_95 = arith.constant 0 : index
    %c0_96 = arith.constant 0 : index
    %211 = vector.load %arg7[%c1_94, %c0_95, %c0_96] : memref<2x32x96xf32, #tpu.memory_space<vmem>>, vector<1x32x96xf32>
    %212 = vector.shape_cast %211 : vector<1x32x96xf32> to vector<32x96xf32>
    %cst_97 = arith.constant dense<0.000000e+00> : vector<16x96xf32>
    %213 = tpu.matmul %210, %212, %cst_97 {dimension_numbers = #tpu.dot_dimension_numbers<[1], [0], [0], [1], [0, 0, 1, 1], [], []>} : vector<16x32xf32>, vector<32x96xf32>, vector<16x96xf32> -> vector<16x96xf32>
    %c1_98 = arith.constant 1 : index
    %c0_99 = arith.constant 0 : index
    %c0_100 = arith.constant 0 : index
    %214 = vector.load %arg8[%c1_98, %c0_99, %c0_100] : memref<2x1x96xf32, #tpu.memory_space<vmem>>, vector<1x1x96xf32>
    %215 = vector.shape_cast %214 : vector<1x1x96xf32> to vector<1x96xf32>
    %216 = vector.broadcast %215 : vector<1x96xf32> to vector<16x96xf32>
    %217 = arith.addf %213, %216 : vector<16x96xf32>
    %c1_101 = arith.constant 1 : index
    %c0_102 = arith.constant 0 : index
    %c0_103 = arith.constant 0 : index
    %218 = vector.load %arg9[%c1_101, %c0_102, %c0_103] : memref<2x32x32xf32, #tpu.memory_space<vmem>>, vector<1x32x32xf32>
    %219 = vector.shape_cast %218 : vector<1x32x32xf32> to vector<32x32xf32>
    %cst_104 = arith.constant 0.000000e+00 : f32
    %220 = vector.broadcast %cst_104 : f32 to vector<16x32xf32>
    %221 = vector.extract_strided_slice %217 {offsets = [0, 0], sizes = [16, 8], strides = [1, 1]} : vector<16x96xf32> to vector<16x8xf32>
    %222 = vector.extract_strided_slice %217 {offsets = [0, 32], sizes = [16, 8], strides = [1, 1]} : vector<16x96xf32> to vector<16x8xf32>
    %223 = vector.extract_strided_slice %217 {offsets = [0, 64], sizes = [16, 8], strides = [1, 1]} : vector<16x96xf32> to vector<16x8xf32>
    %cst_105 = arith.constant dense<0.000000e+00> : vector<16x16xf32>
    %224 = tpu.matmul %221, %222, %cst_105 {dimension_numbers = #tpu.dot_dimension_numbers<[1], [1], [0], [0], [0, 0, 1, 0], [], []>} : vector<16x8xf32>, vector<16x8xf32>, vector<16x16xf32> -> vector<16x16xf32>
    %cst_106 = arith.constant 0.353553385 : f32
    %225 = vector.broadcast %cst_106 : f32 to vector<16x16xf32>
    %226 = arith.mulf %224, %225 : vector<16x16xf32>
    %227 = arith.addf %226, %16 : vector<16x16xf32>
    %cst_107 = arith.constant dense<0xFF800000> : vector<16xf32>
    %228 = vector.multi_reduction <maximumf>, %227, %cst_107 [1] : vector<16x16xf32> to vector<16xf32>
    %229 = vector.shape_cast %228 : vector<16xf32> to vector<16x1xf32>
    %230 = vector.broadcast %229 : vector<16x1xf32> to vector<16x16xf32>
    %231 = arith.subf %227, %230 : vector<16x16xf32>
    %232 = math.exp %231 : vector<16x16xf32>
    %cst_108 = arith.constant dense<0.000000e+00> : vector<16xf32>
    %233 = vector.multi_reduction <add>, %232, %cst_108 [1] : vector<16x16xf32> to vector<16xf32>
    %234 = vector.shape_cast %233 : vector<16xf32> to vector<16x1xf32>
    %235 = tpu.reciprocal %234 {approx = true} : vector<16x1xf32> -> vector<16x1xf32>
    %236 = vector.broadcast %235 : vector<16x1xf32> to vector<16x16xf32>
    %237 = arith.mulf %232, %236 : vector<16x16xf32>
    %cst_109 = arith.constant dense<0.000000e+00> : vector<16x8xf32>
    %238 = tpu.matmul %237, %223, %cst_109 {dimension_numbers = #tpu.dot_dimension_numbers<[1], [0], [0], [1], [0, 0, 1, 1], [], []>} : vector<16x16xf32>, vector<16x8xf32>, vector<16x8xf32> -> vector<16x8xf32>
    %239 = vector.extract_strided_slice %219 {offsets = [0, 0], sizes = [8, 32], strides = [1, 1]} : vector<32x32xf32> to vector<8x32xf32>
    %cst_110 = arith.constant dense<0.000000e+00> : vector<16x32xf32>
    %240 = tpu.matmul %238, %239, %cst_110 {dimension_numbers = #tpu.dot_dimension_numbers<[1], [0], [0], [1], [0, 0, 1, 1], [], []>} : vector<16x8xf32>, vector<8x32xf32>, vector<16x32xf32> -> vector<16x32xf32>
    %241 = arith.addf %220, %240 : vector<16x32xf32>
    %242 = vector.extract_strided_slice %217 {offsets = [0, 8], sizes = [16, 8], strides = [1, 1]} : vector<16x96xf32> to vector<16x8xf32>
    %243 = vector.extract_strided_slice %217 {offsets = [0, 40], sizes = [16, 8], strides = [1, 1]} : vector<16x96xf32> to vector<16x8xf32>
    %244 = vector.extract_strided_slice %217 {offsets = [0, 72], sizes = [16, 8], strides = [1, 1]} : vector<16x96xf32> to vector<16x8xf32>
    %cst_111 = arith.constant dense<0.000000e+00> : vector<16x16xf32>
    %245 = tpu.matmul %242, %243, %cst_111 {dimension_numbers = #tpu.dot_dimension_numbers<[1], [1], [0], [0], [0, 0, 1, 0], [], []>} : vector<16x8xf32>, vector<16x8xf32>, vector<16x16xf32> -> vector<16x16xf32>
    %cst_112 = arith.constant 0.353553385 : f32
    %246 = vector.broadcast %cst_112 : f32 to vector<16x16xf32>
    %247 = arith.mulf %245, %246 : vector<16x16xf32>
    %248 = arith.addf %247, %16 : vector<16x16xf32>
    %cst_113 = arith.constant dense<0xFF800000> : vector<16xf32>
    %249 = vector.multi_reduction <maximumf>, %248, %cst_113 [1] : vector<16x16xf32> to vector<16xf32>
    %250 = vector.shape_cast %249 : vector<16xf32> to vector<16x1xf32>
    %251 = vector.broadcast %250 : vector<16x1xf32> to vector<16x16xf32>
    %252 = arith.subf %248, %251 : vector<16x16xf32>
    %253 = math.exp %252 : vector<16x16xf32>
    %cst_114 = arith.constant dense<0.000000e+00> : vector<16xf32>
    %254 = vector.multi_reduction <add>, %253, %cst_114 [1] : vector<16x16xf32> to vector<16xf32>
    %255 = vector.shape_cast %254 : vector<16xf32> to vector<16x1xf32>
    %256 = tpu.reciprocal %255 {approx = true} : vector<16x1xf32> -> vector<16x1xf32>
    %257 = vector.broadcast %256 : vector<16x1xf32> to vector<16x16xf32>
    %258 = arith.mulf %253, %257 : vector<16x16xf32>
    %cst_115 = arith.constant dense<0.000000e+00> : vector<16x8xf32>
    %259 = tpu.matmul %258, %244, %cst_115 {dimension_numbers = #tpu.dot_dimension_numbers<[1], [0], [0], [1], [0, 0, 1, 1], [], []>} : vector<16x16xf32>, vector<16x8xf32>, vector<16x8xf32> -> vector<16x8xf32>
    %260 = vector.extract_strided_slice %219 {offsets = [8, 0], sizes = [8, 32], strides = [1, 1]} : vector<32x32xf32> to vector<8x32xf32>
    %cst_116 = arith.constant dense<0.000000e+00> : vector<16x32xf32>
    %261 = tpu.matmul %259, %260, %cst_116 {dimension_numbers = #tpu.dot_dimension_numbers<[1], [0], [0], [1], [0, 0, 1, 1], [], []>} : vector<16x8xf32>, vector<8x32xf32>, vector<16x32xf32> -> vector<16x32xf32>
    %262 = arith.addf %241, %261 : vector<16x32xf32>
    %263 = vector.extract_strided_slice %217 {offsets = [0, 16], sizes = [16, 8], strides = [1, 1]} : vector<16x96xf32> to vector<16x8xf32>
    %264 = vector.extract_strided_slice %217 {offsets = [0, 48], sizes = [16, 8], strides = [1, 1]} : vector<16x96xf32> to vector<16x8xf32>
    %265 = vector.extract_strided_slice %217 {offsets = [0, 80], sizes = [16, 8], strides = [1, 1]} : vector<16x96xf32> to vector<16x8xf32>
    %cst_117 = arith.constant dense<0.000000e+00> : vector<16x16xf32>
    %266 = tpu.matmul %263, %264, %cst_117 {dimension_numbers = #tpu.dot_dimension_numbers<[1], [1], [0], [0], [0, 0, 1, 0], [], []>} : vector<16x8xf32>, vector<16x8xf32>, vector<16x16xf32> -> vector<16x16xf32>
    %cst_118 = arith.constant 0.353553385 : f32
    %267 = vector.broadcast %cst_118 : f32 to vector<16x16xf32>
    %268 = arith.mulf %266, %267 : vector<16x16xf32>
    %269 = arith.addf %268, %16 : vector<16x16xf32>
    %cst_119 = arith.constant dense<0xFF800000> : vector<16xf32>
    %270 = vector.multi_reduction <maximumf>, %269, %cst_119 [1] : vector<16x16xf32> to vector<16xf32>
    %271 = vector.shape_cast %270 : vector<16xf32> to vector<16x1xf32>
    %272 = vector.broadcast %271 : vector<16x1xf32> to vector<16x16xf32>
    %273 = arith.subf %269, %272 : vector<16x16xf32>
    %274 = math.exp %273 : vector<16x16xf32>
    %cst_120 = arith.constant dense<0.000000e+00> : vector<16xf32>
    %275 = vector.multi_reduction <add>, %274, %cst_120 [1] : vector<16x16xf32> to vector<16xf32>
    %276 = vector.shape_cast %275 : vector<16xf32> to vector<16x1xf32>
    %277 = tpu.reciprocal %276 {approx = true} : vector<16x1xf32> -> vector<16x1xf32>
    %278 = vector.broadcast %277 : vector<16x1xf32> to vector<16x16xf32>
    %279 = arith.mulf %274, %278 : vector<16x16xf32>
    %cst_121 = arith.constant dense<0.000000e+00> : vector<16x8xf32>
    %280 = tpu.matmul %279, %265, %cst_121 {dimension_numbers = #tpu.dot_dimension_numbers<[1], [0], [0], [1], [0, 0, 1, 1], [], []>} : vector<16x16xf32>, vector<16x8xf32>, vector<16x8xf32> -> vector<16x8xf32>
    %281 = vector.extract_strided_slice %219 {offsets = [16, 0], sizes = [8, 32], strides = [1, 1]} : vector<32x32xf32> to vector<8x32xf32>
    %cst_122 = arith.constant dense<0.000000e+00> : vector<16x32xf32>
    %282 = tpu.matmul %280, %281, %cst_122 {dimension_numbers = #tpu.dot_dimension_numbers<[1], [0], [0], [1], [0, 0, 1, 1], [], []>} : vector<16x8xf32>, vector<8x32xf32>, vector<16x32xf32> -> vector<16x32xf32>
    %283 = arith.addf %262, %282 : vector<16x32xf32>
    %284 = vector.extract_strided_slice %217 {offsets = [0, 24], sizes = [16, 8], strides = [1, 1]} : vector<16x96xf32> to vector<16x8xf32>
    %285 = vector.extract_strided_slice %217 {offsets = [0, 56], sizes = [16, 8], strides = [1, 1]} : vector<16x96xf32> to vector<16x8xf32>
    %286 = vector.extract_strided_slice %217 {offsets = [0, 88], sizes = [16, 8], strides = [1, 1]} : vector<16x96xf32> to vector<16x8xf32>
    %cst_123 = arith.constant dense<0.000000e+00> : vector<16x16xf32>
    %287 = tpu.matmul %284, %285, %cst_123 {dimension_numbers = #tpu.dot_dimension_numbers<[1], [1], [0], [0], [0, 0, 1, 0], [], []>} : vector<16x8xf32>, vector<16x8xf32>, vector<16x16xf32> -> vector<16x16xf32>
    %cst_124 = arith.constant 0.353553385 : f32
    %288 = vector.broadcast %cst_124 : f32 to vector<16x16xf32>
    %289 = arith.mulf %287, %288 : vector<16x16xf32>
    %290 = arith.addf %289, %16 : vector<16x16xf32>
    %cst_125 = arith.constant dense<0xFF800000> : vector<16xf32>
    %291 = vector.multi_reduction <maximumf>, %290, %cst_125 [1] : vector<16x16xf32> to vector<16xf32>
    %292 = vector.shape_cast %291 : vector<16xf32> to vector<16x1xf32>
    %293 = vector.broadcast %292 : vector<16x1xf32> to vector<16x16xf32>
    %294 = arith.subf %290, %293 : vector<16x16xf32>
    %295 = math.exp %294 : vector<16x16xf32>
    %cst_126 = arith.constant dense<0.000000e+00> : vector<16xf32>
    %296 = vector.multi_reduction <add>, %295, %cst_126 [1] : vector<16x16xf32> to vector<16xf32>
    %297 = vector.shape_cast %296 : vector<16xf32> to vector<16x1xf32>
    %298 = tpu.reciprocal %297 {approx = true} : vector<16x1xf32> -> vector<16x1xf32>
    %299 = vector.broadcast %298 : vector<16x1xf32> to vector<16x16xf32>
    %300 = arith.mulf %295, %299 : vector<16x16xf32>
    %cst_127 = arith.constant dense<0.000000e+00> : vector<16x8xf32>
    %301 = tpu.matmul %300, %286, %cst_127 {dimension_numbers = #tpu.dot_dimension_numbers<[1], [0], [0], [1], [0, 0, 1, 1], [], []>} : vector<16x16xf32>, vector<16x8xf32>, vector<16x8xf32> -> vector<16x8xf32>
    %302 = vector.extract_strided_slice %219 {offsets = [24, 0], sizes = [8, 32], strides = [1, 1]} : vector<32x32xf32> to vector<8x32xf32>
    %cst_128 = arith.constant dense<0.000000e+00> : vector<16x32xf32>
    %303 = tpu.matmul %301, %302, %cst_128 {dimension_numbers = #tpu.dot_dimension_numbers<[1], [0], [0], [1], [0, 0, 1, 1], [], []>} : vector<16x8xf32>, vector<8x32xf32>, vector<16x32xf32> -> vector<16x32xf32>
    %304 = arith.addf %283, %303 : vector<16x32xf32>
    %305 = arith.addf %186, %304 : vector<16x32xf32>
    %c1_129 = arith.constant 1 : index
    %c0_130 = arith.constant 0 : index
    %c0_131 = arith.constant 0 : index
    %306 = vector.load %arg10[%c1_129, %c0_130, %c0_131] : memref<2x1x32xf32, #tpu.memory_space<vmem>>, vector<1x1x32xf32>
    %307 = vector.shape_cast %306 : vector<1x1x32xf32> to vector<1x32xf32>
    %308 = vector.broadcast %307 : vector<1x32xf32> to vector<16x32xf32>
    %309 = arith.addf %305, %308 : vector<16x32xf32>
    %c1_132 = arith.constant 1 : index
    %c0_133 = arith.constant 0 : index
    %c0_134 = arith.constant 0 : index
    %310 = vector.load %arg11[%c1_132, %c0_133, %c0_134] : memref<2x1x32xf32, #tpu.memory_space<vmem>>, vector<1x1x32xf32>
    %311 = vector.shape_cast %310 : vector<1x1x32xf32> to vector<1x32xf32>
    %c1_135 = arith.constant 1 : index
    %c0_136 = arith.constant 0 : index
    %c0_137 = arith.constant 0 : index
    %312 = vector.load %arg12[%c1_135, %c0_136, %c0_137] : memref<2x1x32xf32, #tpu.memory_space<vmem>>, vector<1x1x32xf32>
    %313 = vector.shape_cast %312 : vector<1x1x32xf32> to vector<1x32xf32>
    %cst_138 = arith.constant dense<0.000000e+00> : vector<16xf32>
    %314 = vector.multi_reduction <add>, %309, %cst_138 [1] : vector<16x32xf32> to vector<16xf32>
    %315 = vector.shape_cast %314 : vector<16xf32> to vector<16x1xf32>
    %cst_139 = arith.constant 3.200000e+01 : f32
    %316 = vector.broadcast %cst_139 : f32 to vector<16x1xf32>
    %317 = arith.divf %315, %316 : vector<16x1xf32>
    %318 = vector.broadcast %317 : vector<16x1xf32> to vector<16x32xf32>
    %319 = arith.subf %309, %318 : vector<16x32xf32>
    %320 = arith.mulf %319, %319 : vector<16x32xf32>
    %cst_140 = arith.constant dense<0.000000e+00> : vector<16xf32>
    %321 = vector.multi_reduction <add>, %320, %cst_140 [1] : vector<16x32xf32> to vector<16xf32>
    %322 = vector.shape_cast %321 : vector<16xf32> to vector<16x1xf32>
    %cst_141 = arith.constant 3.200000e+01 : f32
    %323 = vector.broadcast %cst_141 : f32 to vector<16x1xf32>
    %324 = arith.divf %322, %323 : vector<16x1xf32>
    %cst_142 = arith.constant 9.99999974E-6 : f32
    %325 = vector.broadcast %cst_142 : f32 to vector<16x1xf32>
    %326 = arith.addf %324, %325 : vector<16x1xf32>
    %327 = math.rsqrt %326 : vector<16x1xf32>
    %328 = vector.broadcast %327 : vector<16x1xf32> to vector<16x32xf32>
    %329 = arith.mulf %319, %328 : vector<16x32xf32>
    %330 = vector.broadcast %311 : vector<1x32xf32> to vector<16x32xf32>
    %331 = arith.mulf %329, %330 : vector<16x32xf32>
    %332 = vector.broadcast %313 : vector<1x32xf32> to vector<16x32xf32>
    %333 = arith.addf %331, %332 : vector<16x32xf32>
    %c1_143 = arith.constant 1 : index
    %c0_144 = arith.constant 0 : index
    %c0_145 = arith.constant 0 : index
    %334 = vector.load %arg13[%c1_143, %c0_144, %c0_145] : memref<2x32x128xf32, #tpu.memory_space<vmem>>, vector<1x32x128xf32>
    %335 = vector.shape_cast %334 : vector<1x32x128xf32> to vector<32x128xf32>
    %cst_146 = arith.constant dense<0.000000e+00> : vector<16x128xf32>
    %336 = tpu.matmul %333, %335, %cst_146 {dimension_numbers = #tpu.dot_dimension_numbers<[1], [0], [0], [1], [0, 0, 1, 1], [], []>} : vector<16x32xf32>, vector<32x128xf32>, vector<16x128xf32> -> vector<16x128xf32>
    %c1_147 = arith.constant 1 : index
    %c0_148 = arith.constant 0 : index
    %c0_149 = arith.constant 0 : index
    %337 = vector.load %arg14[%c1_147, %c0_148, %c0_149] : memref<2x1x128xf32, #tpu.memory_space<vmem>>, vector<1x1x128xf32>
    %338 = vector.shape_cast %337 : vector<1x1x128xf32> to vector<1x128xf32>
    %339 = vector.broadcast %338 : vector<1x128xf32> to vector<16x128xf32>
    %340 = arith.addf %336, %339 : vector<16x128xf32>
    %cst_150 = arith.constant 1.702000e+00 : f32
    %341 = vector.broadcast %cst_150 : f32 to vector<16x128xf32>
    %342 = arith.mulf %341, %340 : vector<16x128xf32>
    %343 = arith.negf %342 : vector<16x128xf32>
    %344 = math.exp %343 : vector<16x128xf32>
    %cst_151 = arith.constant 1.000000e+00 : f32
    %345 = vector.broadcast %cst_151 : f32 to vector<16x128xf32>
    %346 = arith.addf %345, %344 : vector<16x128xf32>
    %347 = arith.divf %345, %346 : vector<16x128xf32>
    %348 = arith.mulf %340, %347 : vector<16x128xf32>
    %c1_152 = arith.constant 1 : index
    %c0_153 = arith.constant 0 : index
    %c0_154 = arith.constant 0 : index
    %349 = vector.load %arg15[%c1_152, %c0_153, %c0_154] : memref<2x128x32xf32, #tpu.memory_space<vmem>>, vector<1x128x32xf32>
    %350 = vector.shape_cast %349 : vector<1x128x32xf32> to vector<128x32xf32>
    %cst_155 = arith.constant dense<0.000000e+00> : vector<16x32xf32>
    %351 = tpu.matmul %348, %350, %cst_155 {dimension_numbers = #tpu.dot_dimension_numbers<[1], [0], [0], [1], [0, 0, 1, 1], [], []>} : vector<16x128xf32>, vector<128x32xf32>, vector<16x32xf32> -> vector<16x32xf32>
    %352 = arith.addf %309, %351 : vector<16x32xf32>
    %c1_156 = arith.constant 1 : index
    %c0_157 = arith.constant 0 : index
    %c0_158 = arith.constant 0 : index
    %353 = vector.load %arg16[%c1_156, %c0_157, %c0_158] : memref<2x1x32xf32, #tpu.memory_space<vmem>>, vector<1x1x32xf32>
    %354 = vector.shape_cast %353 : vector<1x1x32xf32> to vector<1x32xf32>
    %355 = vector.broadcast %354 : vector<1x32xf32> to vector<16x32xf32>
    %356 = arith.addf %352, %355 : vector<16x32xf32>
    %c0_159 = arith.constant 0 : index
    %c0_160 = arith.constant 0 : index
    %357 = vector.load %arg17[%c0_159, %c0_160] : memref<1x32xf32, #tpu.memory_space<vmem>>, vector<1x32xf32>
    %c0_161 = arith.constant 0 : index
    %c0_162 = arith.constant 0 : index
    %358 = vector.load %arg18[%c0_161, %c0_162] : memref<1x32xf32, #tpu.memory_space<vmem>>, vector<1x32xf32>
    %cst_163 = arith.constant dense<0.000000e+00> : vector<16xf32>
    %359 = vector.multi_reduction <add>, %356, %cst_163 [1] : vector<16x32xf32> to vector<16xf32>
    %360 = vector.shape_cast %359 : vector<16xf32> to vector<16x1xf32>
    %cst_164 = arith.constant 3.200000e+01 : f32
    %361 = vector.broadcast %cst_164 : f32 to vector<16x1xf32>
    %362 = arith.divf %360, %361 : vector<16x1xf32>
    %363 = vector.broadcast %362 : vector<16x1xf32> to vector<16x32xf32>
    %364 = arith.subf %356, %363 : vector<16x32xf32>
    %365 = arith.mulf %364, %364 : vector<16x32xf32>
    %cst_165 = arith.constant dense<0.000000e+00> : vector<16xf32>
    %366 = vector.multi_reduction <add>, %365, %cst_165 [1] : vector<16x32xf32> to vector<16xf32>
    %367 = vector.shape_cast %366 : vector<16xf32> to vector<16x1xf32>
    %cst_166 = arith.constant 3.200000e+01 : f32
    %368 = vector.broadcast %cst_166 : f32 to vector<16x1xf32>
    %369 = arith.divf %367, %368 : vector<16x1xf32>
    %cst_167 = arith.constant 9.99999974E-6 : f32
    %370 = vector.broadcast %cst_167 : f32 to vector<16x1xf32>
    %371 = arith.addf %369, %370 : vector<16x1xf32>
    %372 = math.rsqrt %371 : vector<16x1xf32>
    %373 = vector.broadcast %372 : vector<16x1xf32> to vector<16x32xf32>
    %374 = arith.mulf %364, %373 : vector<16x32xf32>
    %375 = vector.broadcast %357 : vector<1x32xf32> to vector<16x32xf32>
    %376 = arith.mulf %374, %375 : vector<16x32xf32>
    %377 = vector.broadcast %358 : vector<1x32xf32> to vector<16x32xf32>
    %378 = arith.addf %376, %377 : vector<16x32xf32>
    %c0_168 = arith.constant 0 : index
    %c0_169 = arith.constant 0 : index
    %c0_170 = arith.constant 0 : index
    %379 = vector.load %arg2[%c0_168, %c0_169, %c0_170] : memref<1x1x16xf32, #tpu.memory_space<vmem>>, vector<1x1x16xf32>
    %380 = vector.shape_cast %379 : vector<1x1x16xf32> to vector<1x16xf32>
    %cst_171 = arith.constant dense<0.000000e+00> : vector<1x32xf32>
    %381 = tpu.matmul %380, %378, %cst_171 {dimension_numbers = #tpu.dot_dimension_numbers<[1], [0], [0], [1], [0, 0, 1, 1], [], []>} : vector<1x16xf32>, vector<16x32xf32>, vector<1x32xf32> -> vector<1x32xf32>
    %c0_172 = arith.constant 0 : index
    %c0_173 = arith.constant 0 : index
    %382 = vector.load %arg19[%c0_172, %c0_173] : memref<32x16xf32, #tpu.memory_space<vmem>>, vector<32x16xf32>
    %cst_174 = arith.constant dense<0.000000e+00> : vector<1x16xf32>
    %383 = tpu.matmul %381, %382, %cst_174 {dimension_numbers = #tpu.dot_dimension_numbers<[1], [0], [0], [1], [0, 0, 1, 1], [], []>} : vector<1x32xf32>, vector<32x16xf32>, vector<1x16xf32> -> vector<1x16xf32>
    %384 = arith.mulf %383, %383 : vector<1x16xf32>
    %cst_175 = arith.constant dense<0.000000e+00> : vector<1xf32>
    %385 = vector.multi_reduction <add>, %384, %cst_175 [1] : vector<1x16xf32> to vector<1xf32>
    %386 = vector.shape_cast %385 : vector<1xf32> to vector<1x1xf32>
    %387 = math.rsqrt %386 : vector<1x1xf32>
    %388 = vector.broadcast %387 : vector<1x1xf32> to vector<1x16xf32>
    %389 = arith.mulf %383, %388 : vector<1x16xf32>
    %c0_176 = arith.constant 0 : index
    %c0_177 = arith.constant 0 : index
    %c0_178 = arith.constant 0 : index
    %390 = vector.load %arg20[%c0_176, %c0_177, %c0_178] : memref<1x1x16xf32, #tpu.memory_space<vmem>>, vector<1x1x16xf32>
    %391 = vector.shape_cast %390 : vector<1x1x16xf32> to vector<1x16xf32>
    %392 = vector.shape_cast %389 : vector<1x16xf32> to vector<1x1x16xf32>
    tpu.vector_store %arg20[%c0_176, %c0_177, %c0_178], %392 {strides = array<i32>} : memref<1x1x16xf32, #tpu.memory_space<vmem>>, vector<1x1x16xf32>,
    return
  }
  func.func @transform_0(%arg0: i32) -> (i32, i32, i32) {
    %c0_i32 = arith.constant 0 : i32
    %c0_i32_0 = arith.constant 0 : i32
    %c0_i32_1 = arith.constant 0 : i32
    return %arg0, %c0_i32, %c0_i32_0 : i32, i32, i32
  }
  func.func @transform_1(%arg0: i32) -> (i32, i32, i32) {
    %c0_i32 = arith.constant 0 : i32
    %c0_i32_0 = arith.constant 0 : i32
    %c0_i32_1 = arith.constant 0 : i32
    return %arg0, %c0_i32, %c0_i32_0 : i32, i32, i32
  }
  func.func @transform_2(%arg0: i32) -> (i32, i32) {
    %c0_i32 = arith.constant 0 : i32
    %c0_i32_0 = arith.constant 0 : i32
    %c0_i32_1 = arith.constant 0 : i32
    return %c0_i32, %c0_i32_0 : i32, i32
  }
  func.func @transform_3(%arg0: i32) -> (i32, i32) {
    %c0_i32 = arith.constant 0 : i32
    %c0_i32_0 = arith.constant 0 : i32
    %c0_i32_1 = arith.constant 0 : i32
    return %c0_i32, %c0_i32_0 : i32, i32
  }
  func.func @transform_4(%arg0: i32) -> (i32, i32, i32) {
    %c0_i32 = arith.constant 0 : i32
    %c0_i32_0 = arith.constant 0 : i32
    %c0_i32_1 = arith.constant 0 : i32
    %c0_i32_2 = arith.constant 0 : i32
    return %c0_i32, %c0_i32_0, %c0_i32_1 : i32, i32, i32
  }
  func.func @transform_5(%arg0: i32) -> (i32, i32, i32) {
    %c0_i32 = arith.constant 0 : i32
    %c0_i32_0 = arith.constant 0 : i32
    %c0_i32_1 = arith.constant 0 : i32
    %c0_i32_2 = arith.constant 0 : i32
    return %c0_i32, %c0_i32_0, %c0_i32_1 : i32, i32, i32
  }
  func.func @transform_6(%arg0: i32) -> (i32, i32, i32) {
    %c0_i32 = arith.constant 0 : i32
    %c0_i32_0 = arith.constant 0 : i32
    %c0_i32_1 = arith.constant 0 : i32
    %c0_i32_2 = arith.constant 0 : i32
    return %c0_i32, %c0_i32_0, %c0_i32_1 : i32, i32, i32
  }
  func.func @transform_7(%arg0: i32) -> (i32, i32, i32) {
    %c0_i32 = arith.constant 0 : i32
    %c0_i32_0 = arith.constant 0 : i32
    %c0_i32_1 = arith.constant 0 : i32
    %c0_i32_2 = arith.constant 0 : i32
    return %c0_i32, %c0_i32_0, %c0_i32_1 : i32, i32, i32
  }
  func.func @transform_8(%arg0: i32) -> (i32, i32, i32) {
    %c0_i32 = arith.constant 0 : i32
    %c0_i32_0 = arith.constant 0 : i32
    %c0_i32_1 = arith.constant 0 : i32
    %c0_i32_2 = arith.constant 0 : i32
    return %c0_i32, %c0_i32_0, %c0_i32_1 : i32, i32, i32
  }
  func.func @transform_9(%arg0: i32) -> (i32, i32, i32) {
    %c0_i32 = arith.constant 0 : i32
    %c0_i32_0 = arith.constant 0 : i32
    %c0_i32_1 = arith.constant 0 : i32
    %c0_i32_2 = arith.constant 0 : i32
    return %c0_i32, %c0_i32_0, %c0_i32_1 : i32, i32, i32
  }
  func.func @transform_10(%arg0: i32) -> (i32, i32, i32) {
    %c0_i32 = arith.constant 0 : i32
    %c0_i32_0 = arith.constant 0 : i32
    %c0_i32_1 = arith.constant 0 : i32
    %c0_i32_2 = arith.constant 0 : i32
    return %c0_i32, %c0_i32_0, %c0_i32_1 : i32, i32, i32
  }
  func.func @transform_11(%arg0: i32) -> (i32, i32, i32) {
    %c0_i32 = arith.constant 0 : i32
    %c0_i32_0 = arith.constant 0 : i32
    %c0_i32_1 = arith.constant 0 : i32
    %c0_i32_2 = arith.constant 0 : i32
    return %c0_i32, %c0_i32_0, %c0_i32_1 : i32, i32, i32
  }
  func.func @transform_12(%arg0: i32) -> (i32, i32, i32) {
    %c0_i32 = arith.constant 0 : i32
    %c0_i32_0 = arith.constant 0 : i32
    %c0_i32_1 = arith.constant 0 : i32
    %c0_i32_2 = arith.constant 0 : i32
    return %c0_i32, %c0_i32_0, %c0_i32_1 : i32, i32, i32
  }
  func.func @transform_13(%arg0: i32) -> (i32, i32, i32) {
    %c0_i32 = arith.constant 0 : i32
    %c0_i32_0 = arith.constant 0 : i32
    %c0_i32_1 = arith.constant 0 : i32
    %c0_i32_2 = arith.constant 0 : i32
    return %c0_i32, %c0_i32_0, %c0_i32_1 : i32, i32, i32
  }
  func.func @transform_14(%arg0: i32) -> (i32, i32, i32) {
    %c0_i32 = arith.constant 0 : i32
    %c0_i32_0 = arith.constant 0 : i32
    %c0_i32_1 = arith.constant 0 : i32
    %c0_i32_2 = arith.constant 0 : i32
    return %c0_i32, %c0_i32_0, %c0_i32_1 : i32, i32, i32
  }
  func.func @transform_15(%arg0: i32) -> (i32, i32, i32) {
    %c0_i32 = arith.constant 0 : i32
    %c0_i32_0 = arith.constant 0 : i32
    %c0_i32_1 = arith.constant 0 : i32
    %c0_i32_2 = arith.constant 0 : i32
    return %c0_i32, %c0_i32_0, %c0_i32_1 : i32, i32, i32
  }
  func.func @transform_16(%arg0: i32) -> (i32, i32) {
    %c0_i32 = arith.constant 0 : i32
    %c0_i32_0 = arith.constant 0 : i32
    %c0_i32_1 = arith.constant 0 : i32
    return %c0_i32, %c0_i32_0 : i32, i32
  }
  func.func @transform_17(%arg0: i32) -> (i32, i32) {
    %c0_i32 = arith.constant 0 : i32
    %c0_i32_0 = arith.constant 0 : i32
    %c0_i32_1 = arith.constant 0 : i32
    return %c0_i32, %c0_i32_0 : i32, i32
  }
  func.func @transform_18(%arg0: i32) -> (i32, i32) {
    %c0_i32 = arith.constant 0 : i32
    %c0_i32_0 = arith.constant 0 : i32
    %c0_i32_1 = arith.constant 0 : i32
    return %c0_i32, %c0_i32_0 : i32, i32
  }
  func.func @transform_19(%arg0: i32) -> (i32, i32, i32) {
    %c0_i32 = arith.constant 0 : i32
    %c0_i32_0 = arith.constant 0 : i32
    %c0_i32_1 = arith.constant 0 : i32
    return %arg0, %c0_i32, %c0_i32_0 : i32, i32, i32
  }
}

</mosaic_0001>

<bundles_post_ra>
// kernel: tpu_custom_call.1
= control target key start
LH: loop header
LB: loop body
LE: loop exit
PB: predicated region body
PF: predicated region fallthrough
CT: control target
= control target key end

     0   :  { %s3680_s0 = inlined_call_operand.vmem [shape: s32[2,16,1], index: 0, kind: input, shape index: {}]   ;;  %s3681_s1 = inlined_call_operand.vmem [shape: f32[2,1,16], index: 1, kind: input, shape index: {}]   ;;  %s3682_s2 = inlined_call_operand.vmem [shape: f32[64,32], index: 2, kind: input, shape index: {}]   ;;  %s3683_s3 = inlined_call_operand.vmem [shape: f32[16,32], index: 3, kind: input, shape index: {}]   ;;  %s3684_s4 = inlined_call_operand.vmem [shape: f32[2,1,32], index: 4, kind: input, shape index: {}]   ;;  %s3685_s5 = inlined_call_operand.vmem [shape: f32[2,1,32], index: 5, kind: input, shape index: {}]   ;;  %s3686_s6 = inlined_call_operand.vmem [shape: f32[2,32,96], index: 6, kind: input, shape index: {}]   ;;  %s3687_s7 = inlined_call_operand.vmem [shape: f32[2,1,96], index: 7, kind: input, shape index: {}]   ;;  %s3688_s8 = inlined_call_operand.vmem [shape: f32[2,32,32], index: 8, kind: input, shape index: {}]   ;;  %s3689_s9 = inlined_call_operand.vmem [shape: f32[2,1,32], index: 9, kind: input, shape index: {}]   ;;  %s3690_s10 = inlined_call_operand.vmem [shape: f32[2,1,32], index: 10, kind: input, shape index: {}]   ;;  %s3691_s11 = inlined_call_operand.vmem [shape: f32[2,1,32], index: 11, kind: input, shape index: {}]   ;;  %s3692_s12 = inlined_call_operand.vmem [shape: f32[2,32,128], index: 12, kind: input, shape index: {}]   ;;  %s3693_s13 = inlined_call_operand.vmem [shape: f32[2,1,128], index: 13, kind: input, shape index: {}]   ;;  %s3694_s14 = inlined_call_operand.vmem [shape: f32[2,128,32], index: 14, kind: input, shape index: {}]   ;;  %s3695_s15 = inlined_call_operand.vmem [shape: f32[2,1,32], index: 15, kind: input, shape index: {}]   ;;  %s3696_s16 = inlined_call_operand.vmem [shape: f32[1,32], index: 16, kind: input, shape index: {}]   ;;  %s3697_s17 = inlined_call_operand.vmem [shape: f32[1,32], index: 17, kind: input, shape index: {}]   ;;  %s3698_s18 = inlined_call_operand.vmem [shape: f32[32,16], index: 18, kind: input, shape index: {}]   ;;  %s3699_s19 = inlined_call_operand.hbm [shape: f32[2,1,16], index: 19, kind: output, shape index: {}]  }
   0x1   :  { %3728 = sst [smem:[#allocation12_spill]] %s3680_s0 }
   0x2   :  { %3729 = sst [smem:[#allocation13_spill]] %s3681_s1 }
   0x3   :  { %3730 = sst [smem:[#allocation14_spill]] %s3682_s2 }
   0x4   :  { %3731 = sst [smem:[#allocation15_spill]] %s3683_s3 }
   0x5   :  { %3732 = sst [smem:[#allocation16_spill]] %s3684_s4 }
   0x6   :  { %3733 = sst [smem:[#allocation17_spill]] %s3685_s5 }
   0x7   :  { %3734 = sst [smem:[#allocation18_spill]] %s3686_s6 }
   0x8   :  { %24 = vsyncpa [#allocation3], 0 }
   0x9   :  { %26 = vsyncpa [#allocation3 + $0x1], 0  ;;  %s3042_s0 = smov 0   ;;  %s3044_s30 = smov 0  }
   0xa   :  { %s3046_s20 = smov 0   ;;  %s3048_s21 = smov 0  }
   0xb LB: > { %3735 = sst [smem:[#allocation5_spill]] %s2913_s0  ;;  %s3063_s1 = sadd.s32 4294967295, %s2925_s21   ;;  %s2925_s21 = sphi %s3048_s21, %s3766_s21   ;;  %s2921_s20 = sphi %s3046_s20, %s3768_s20   ;;  %s2917_s30 = sphi %s3044_s30, %s3770_s30   ;;  %s2913_s0 = sphi %s3042_s0, %s3769_s0  }
   0xc   : > { %3736 = sst [smem:[#allocation6_spill]] %s2921_s20  ;;  %s2510_s22 = sadd.s32 4294967294, %s2925_s21  }
   0xd   : > { %3737 = sst [smem:[#allocation7_spill]] %s2925_s21  ;;  %s3067_s2 = sadd.s32 1, %s2925_s21  }
   0xe   : > { %3738 = sst [smem:[#allocation8_spill]] %s3067_s2  ;;  %s448_s23 = sadd.s32 1, %s2921_s20 }
   0xf   : > { %s445_s24 = ssub.s32 %s2925_s21, %s3067_s2  ;;  %p458_p0 = scmp.ne.s32.totalorder %s2921_s20, %s2917_s30 }
  0x10   : > { %p446_p1 = scmp.eq.s32.totalorder %s445_s24, 0  ;;  %p459_p2 = scmp.eq.s32.totalorder %s3063_s1, 1 }
  0x11   : > { %p464_p3 = scmp.ne.s32.totalorder %s2917_s30, %s2913_s0  ;;  %p465_p4 = scmp.eq.s32.totalorder %s2510_s22, 1 }
  0x12   : > { %s3078_s25 = scalar_select %p446_p1, %s2921_s20, %s448_s23  }
  0x13   : > { %p3080_p5 = por %p459_p2, %p458_p0  ;;  %p3084_p6 = por %p465_p4, %p464_p3 }
  0x14   : > { %3739 = sst [smem:[#allocation9_spill]] %s3078_s25  ;;  %p2513_p7 = scmp.ge.s32.totalorder %s2925_s21, 1 }
  0x15   : > { %s3740_s3 = scalar_select %p3080_p5, 1, 0 }
  0x16   : > { %s3742_s26 = scalar_select %p3084_p6, 1, 0 }
  0x17   : > { %3741 = sst [smem:[#allocation10_spill]] %s3740_s3  ;;  %p548_p8 = scmp.lt.s32.totalorder %s2925_s21, 3 }
  0x18   : > { %3743 = sst [smem:[#allocation11_spill]] %s3742_s26 }
  0x19   : > { %p549_p9 = pnand %p2513_p7, %p548_p8 }
  0x1a   : > { %p606_p10 = scmp.lt.s32.totalorder (!%p549_p9), %s3063_s1, 1  ;;  %s3744_s29 = sld [smem:[#allocation14_spill]] (!%p549_p9) }
  0x1b   : > { %552 = sbr.rel (%p549_p9) target bundleno = 5545 (0x15a9), region = 96  ;;  %s3745_s23 = sld [smem:[#allocation12_spill]] (!%p549_p9) }
  0x1c   : > { %s3746_s28 = sld [smem:[#allocation15_spill]] (!%p549_p9)  ;;  %s3726_s21 = smov (!%p549_p9), 96  }
  0x1d   : > { %s3747_s6 = sld [smem:[#allocation18_spill]] (!%p549_p9)  ;;  %s3712_s3 = smov (!%p549_p9), 72  }
  0x1e   : > { %s3748_s4 = sld [smem:[#allocation16_spill]] (!%p549_p9)  ;;  %s3715_s22 = smov (!%p549_p9), 104  }
  0x1f   : > { %s3749_s5 = sld [smem:[#allocation17_spill]] (!%p549_p9)  ;;  %s3723_s20 = smov (!%p549_p9), 88  }
  0x20   : > { %v637_v0 = vld [vmem:[%s3744_s29 + $0x38] sm:$0xff]  ;;  %v636_v1 = vld [vmem:[%s3744_s29 + $0x30] sm:$0xff]  ;;  %v2927_v2 = vmov 0   ;;  %s3098_s24 = scalar_select %p606_p10, %s3063_s1, 1  ;;  %v635_v3 = vld [vmem:[%s3744_s29 + $0x28] sm:$0xff]  ;;  %v616_v11 = vlaneseq  ;;  %vm640_vm0 = vcmask 523264  }
  0x21   : > { %2700 = vset.pattern.permute.xlu0 %v2927_v2  ;;  %655 = vmatpush.msra.mxu0 %v637_v0  ;;  %v634_v4 = vld [vmem:[%s3744_s29 + $0x20] sm:$0xff]  ;;  %v633_v6 = vld [vmem:[%s3744_s29 + $0x18] sm:$0xff]  ;;  %v632_v7 = vld [vmem:[%s3744_s29 + $0x10] sm:$0xff]  ;;  %v2928_v14 = vmov 0.0   ;;  %vm679_vm3 = vcmask 261120   ;;  %v2929_v26 = vmov 32.0  }
  0x22   : > { %2637 = vmatpush.msra.mxu2 %v637_v0  ;;  %s2636_s2 = sshll.u32 %s3098_s24, 4  ;;  %v631_v8 = vld [vmem:[%s3744_s29 + $0x8] sm:$0xff]  ;;  %v630_v10 = vld [vmem:[%s3744_s29] sm:$0xff]  ;;  %v3123_v12 = vand.u32 127, %v616_v11  ;;  %2759 = vrcp.f32 %v2929_v26  ;;  %vm788_vm11 = vcmask 64512   ;;  %vm824_vm13 = vcmask 130048  }
  0x23   : > { %656 = vmatpush.msra.mxu0 %v636_v1  ;;  %s610_s0 = scalar_lea.vmem %s3745_s23, %s2636_s2  ;;  %v638_v18 = vld [vmem:[%s3746_s28] sm:$0xff]  ;;  %v639_v22 = vld [vmem:[%s3746_s28 + $0x8] sm:$0xff]  ;;  %v744_v43 = vld [vmem:[%s3747_s6 + $0x18] sm:$0xff]  ;;  %s3721_s2 = smov 120  }
  0x24   : > { %2638 = vmatpush.msra.mxu2 %v636_v1  ;;  %v614_v5 = vld [vmem:[%s610_s0] sm:$0xff]  ;;  %v615_v9 = vld [vmem:[%s610_s0 + $0x8] sm:$0xff]  ;;  %767 = vmatpush.msra.mxu1 %v744_v43  ;;  %v743_v44 = vld [vmem:[%s3747_s6 + $0x10] sm:$0xff]  ;;  %s3717_s0 = smov 112   ;;  %s3725_s23 = smov 64  }
  0x25   : > { %657 = vmatpush.msra.mxu0 %v635_v3  ;;  %619 = vperm.xlu0 %2700, %v614_v5   ;;  %v742_v45 = vld [vmem:[%s3747_s6 + $0x8] sm:$0xff]  ;;  %v741_v46 = vld [vmem:[%s3747_s6] sm:$0xff]  ;;  %s3719_s25 = smov 80   ;;  %s3711_s26 = smov 56  }
  0x26   : > { %2639 = vmatpush.msra.mxu2 %v635_v3  ;;  %768 = vmatpush.msra.mxu1 %v743_v44  ;;  %v2741_v59 = vld [vmem:[%s3748_s4] ss:$0 sm:$0xff]  ;;  %s3710_s27 = smov 40  }
  0x27   : > { %658 = vmatpush.msra.mxu0 %v634_v4  ;;  %v2742_v62 = vld [vmem:[%s3749_s5] ss:$0 sm:$0xff] }
  0x28   : > { %2640 = vmatpush.msra.mxu2 %v634_v4  ;;  %v2760_v27 = vpop.eup %2759  ;;  %769 = vmatpush.msra.mxu1 %v742_v45 }
  0x29   : > { %659 = vmatpush.msra.mxu0 %v633_v6  ;;  %v687_v28 = vmul.f32 32.0, %v2760_v27  ;;  %vm691_vm4 = vweird.f32 %v2760_v27 }
  0x2a   : > { %2641 = vmatpush.msra.mxu2 %v633_v6  ;;  %770 = vmatpush.msra.mxu1 %v741_v46  ;;  %v778_v46 = vld [vmem:[%s3688_s8] sm:$0xff] }
  0x2b   : > { %660 = vmatpush.msra.mxu0 %v632_v7  ;;  %v688_v29 = vsub.f32 1.0, %v687_v28 }
  0x2c   : > { %2642 = vmatpush.msra.mxu2 %v632_v7 }
  0x2d   : > { %661 = vmatpush.msra.mxu0 %v631_v8  ;;  %622 = vperm.xlu0 %2700, %v615_v9   ;;  %v689_v30 = vmul.f32 %v2760_v27, %v688_v29 }
  0x2e   : > { %2643 = vmatpush.msra.mxu2 %v631_v8 }
  0x2f   : > { %662 = vmatpush.msra.mxu0 %v630_v10  ;;  %v690_v31 = vadd.f32 %v2760_v27, %v689_v30 }
  0x30   : > { %2644 = vmatpush.msra.mxu2 %v630_v10 }
  0x31   : > { %v3141_v32 = vsel %vm691_vm4, %v2760_v27, %v690_v31  ;;  %1032 = vmatpush.msrb.mxu0 %v778_v46 }
  0x97   : > { %v620_v13 = vpop.permute.xlu0 %619 }
  0x98   : > { %vm624_vm1 = vcmp.eq.s32.totalorder %v3123_v12, %v620_v13  ;;  %v2743_v13 = vld [vmem:[%s3687_s7] ss:$0 sm:$0xff] }
  0x99   : > { %v2516_v15 = vsel %vm624_vm1, 1.0, %v2928_v14 }
  0x9a   : > { %2518 = vmatmul.msk.f32.vlgmr.msra.gmra.mxu0 %vm640_vm0, %v2516_v15 }
  0x9f   : > { %v623_v16 = vpop.permute.xlu0 %622 }
  0xa0   : > { %vm625_vm2 = vcmp.eq.s32.totalorder %v3123_v12, %v623_v16 }
  0xa1   : > { %v2517_v17 = vsel %vm625_vm2, 1.0, %v2928_v14 }
  0xa2   : > { %2519 = vmatmul.msk.f32.vlgmr.msra.gmra.mxu2 %vm640_vm0, %v2517_v17 }
 0x117   : > { %v664_v19 = vpop.f32.mrf.mxu0 }
 0x118   : > { %v3130_v20 = vadd.f32 %v664_v19, %v638_v18 }
 0x11a   : > { %v680_v21 = vsel %vm679_vm3, %v3130_v20, 0.0 }
 0x11b   : > { %681 = vadd.xlane.f32.xlu1 %v680_v21  ;;  %v671_v21 = vshrl.u32 %v616_v11, 7 }
 0x11d   : > { %vm673_vm12 = vcmp.le.s32.totalorder %v3123_v12, %v671_v21  ;;  %v672_v26 = vadd.s32 8, %v671_v21 }
 0x11f   : > { %vm674_vm14 = vcmp.le.s32.totalorder %v3123_v12, %v672_v26 }
 0x125   : > { %v667_v23 = vpop.f32.mrf.mxu2 }
 0x126   : > { %v3137_v24 = vadd.f32 %v667_v23, %v639_v22  ;;  %v2931_v22 = vmov -1e+30  }
 0x127   : > { %v3182_v23 = vsel %vm673_vm12, 0.0, %v2931_v22  ;;  %v3187_v30 = vsel %vm674_vm14, 0.0, %v2931_v22 }
 0x128   : > { %v683_v25 = vsel %vm679_vm3, %v3137_v24, 0.0 }
 0x129   : > { %684 = vadd.xlane.f32.xlu1 %v683_v25 }
 0x18e   : > { %v682_v33 = vpop.xlane.xlu1 %681 }
 0x18f   : > { %v693_v34 = vmul.f32 %v3141_v32, %v682_v33 }
 0x191   : > { %v695_v35 = vsub.f32 %v3130_v20, %v693_v34 }
 0x193   : > { %v697_v36 = vmul.f32 %v695_v35, %v695_v35 }
 0x195   : > { %v699_v37 = vsel %vm679_vm3, %v697_v36, 0.0 }
 0x196   : > { %700 = vadd.xlane.f32.xlu2 %v699_v37 }
 0x19c   : > { %v685_v38 = vpop.xlane.xlu1 %684 }
 0x19d   : > { %v694_v39 = vmul.f32 %v3141_v32, %v685_v38 }
 0x19f   : > { %v696_v40 = vsub.f32 %v3137_v24, %v694_v39 }
 0x1a1   : > { %v698_v41 = vmul.f32 %v696_v40, %v696_v40 }
 0x1a3   : > { %v702_v42 = vsel %vm679_vm3, %v698_v41, 0.0 }
 0x1a4   : > { %703 = vadd.xlane.f32.xlu2 %v702_v42 }
 0x209   : > { %v701_v47 = vpop.xlane.xlu2 %700 }
 0x20a   : > { %v705_v48 = vmul.f32 %v701_v47, %v3141_v32 }
 0x20c   : > { %v707_v49 = vadd.f32 1e-05, %v705_v48 }
 0x20e   : > { %2761 = vrsqrt.f32 %v707_v49  ;;  %vm715_vm6 = vweird.f32 %v707_v49 }
 0x214   : > { %v2762_v50 = vpop.eup %2761 }
 0x215   : > { %v710_v51 = vmul.f32 %v2762_v50, %v707_v49  ;;  %vm716_vm5 = vweird.f32 %v2762_v50 }
 0x216   : > { %vm717_vm7 = vmor %vm715_vm6, %vm716_vm5 }
 0x217   : > { %v711_v52 = vmul.f32 %v2762_v50, %v710_v51  ;;  %v704_v53 = vpop.xlane.xlu2 %703 }
 0x218   : > { %v706_v54 = vmul.f32 %v704_v53, %v3141_v32 }
 0x219   : > { %v712_v55 = vmul.f32 0.5, %v711_v52 }
 0x21a   : > { %v708_v56 = vadd.f32 1e-05, %v706_v54 }
 0x21b   : > { %v713_v57 = vsub.f32 1.5, %v712_v55 }
 0x21c   : > { %2763 = vrsqrt.f32 %v708_v56  ;;  %vm725_vm9 = vweird.f32 %v708_v56 }
 0x21d   : > { %v714_v58 = vmul.f32 %v2762_v50, %v713_v57 }
 0x21f   : > { %v718_v60 = vsel %vm717_vm7, %v2762_v50, %v714_v58 }
 0x220   : > { %v729_v61 = vmul.f32 %v718_v60, %v695_v35 }
 0x222   : > { %v2764_v63 = vpop.eup %2763  ;;  %v734_v0 = vmul.f32 %v2741_v59, %v729_v61 }
 0x223   : > { %v720_v1 = vmul.f32 %v2764_v63, %v708_v56  ;;  %vm726_vm8 = vweird.f32 %v2764_v63 }
 0x224   : > { %v739_v2 = vadd.f32 %v2742_v62, %v734_v0  ;;  %vm727_vm10 = vmor %vm725_vm9, %vm726_vm8 }
 0x225   : > { %v721_v3 = vmul.f32 %v2764_v63, %v720_v1 }
 0x226   : > { %2520 = vmatmul.msk.f32.vlgmr.msra.gmra.mxu1 %vm679_vm3, %v739_v2 }
 0x227   : > { %v722_v4 = vmul.f32 0.5, %v721_v3 }
 0x229   : > { %v723_v5 = vsub.f32 1.5, %v722_v4 }
 0x22b   : > { %v724_v6 = vmul.f32 %v2764_v63, %v723_v5 }
 0x22d   : > { %v728_v7 = vsel %vm727_vm10, %v2764_v63, %v724_v6 }
 0x22e   : > { %v730_v8 = vmul.f32 %v728_v7, %v696_v40 }
 0x230   : > { %v735_v9 = vmul.f32 %v2741_v59, %v730_v8 }
 0x232   : > { %v740_v10 = vadd.f32 %v2742_v62, %v735_v9 }
 0x234   : > { %2521 = vmatmul.msk.f32.gmra.mxu1 %vm679_vm3, %v740_v10 }
 0x2a3   : > { %v772_v14 = vpop.f32.mrf.mxu1 }
 0x2a4   : > { %v773_v15 = vadd.f32 %v2743_v13, %v772_v14 }
 0x2a6   : > { %784 = vrot.lane.b32.xlu1 %v773_v15, %s3726_s21 }
 0x2b1   : > { %v775_v16 = vpop.f32.mrf.mxu1 }
 0x2b2   : > { %v776_v17 = vadd.f32 %v2743_v13, %v775_v16 }
 0x2b4   : > { %786 = vrot.lane.b32.xlu0 %v776_v17, %s3726_s21  ;;  %v3197_v44 = vpack.i.bf16 %v773_v15, %v776_v17 }
 0x318   : > { %v785_v19 = vpop.permute.xlu1 %784 }
 0x326   : > { %v787_v18 = vpop.permute.xlu0 %786 }
 0x327   : > { %2522 = vmatpush.xpose.msk.msrb.mxu2 %vm788_vm11, %v787_v18 }
 0x32b   : > { %2523 = vmatpush.xpose.msk.msrb.mxu2 %vm788_vm11, %v785_v19 }
 0x32e   : > { %2524 = vmatmul.msk.f32.vlgmr.msrb.gmra.mxu2 %vm788_vm11, %v773_v15 }
 0x336   : > { %2525 = vmatmul.msk.f32.gmra.mxu2 %vm788_vm11, %v776_v17 }
 0x3b1   : > { %v814_v25 = vpop.f32.mrf.mxu2 }
 0x3b2   : > { %v820_v27 = vmul.f32 0.35355338, %v814_v25 }
 0x3b4   : > { %v822_v28 = vadd.f32 %v820_v27, %v3182_v23 }
 0x3b6   : > { %v825_v29 = vsel %vm824_vm13, %v822_v28, -inf }
 0x3b7   : > { %826 = vmax.xlane.f32.xlu2 %v825_v29 }
 0x3b9   : > { %v817_v31 = vpop.f32.mrf.mxu2 }
 0x3ba   : > { %v821_v11 = vmul.f32 0.35355338, %v817_v31 }
 0x3bc   : > { %v823_v33 = vadd.f32 %v821_v11, %v3187_v30 }
 0x3be   : > { %v828_v34 = vsel %vm824_vm13, %v823_v33, -inf }
 0x3bf   : > { %829 = vmax.xlane.f32.xlu0 %v828_v34 }
 0x3d3   : > { %882 = vrot.lane.b32.xlu0 %v773_v15, %s3721_s2 }
 0x3db   : > { %1040 = vrot.lane.b32.xlu0 %v773_v15, %s3717_s0 }
 0x3e3   : > { %1175 = vrot.lane.b32.xlu0 %v773_v15, %s3712_s3 }
 0x3eb   : > { %1171 = vrot.lane.b32.xlu0 %v773_v15, %s3715_s22 }
 0x42a   : > { %v827_v12 = vpop.xlane.xlu2 %826 }
 0x42b   : > { %v831_v35 = vsub.f32 %v822_v28, %v827_v12 }
 0x42d   : > { %v833_v36 = vmul.f32 1.442695, %v831_v35 }
 0x42f   : > { %2765 = vpow2.f32 %v833_v36 }
 0x432   : > { %v830_v37 = vpop.xlane.xlu0 %829 }
 0x433   : > { %v832_v38 = vsub.f32 %v823_v33, %v830_v37 }
 0x435   : > { %v2766_v39 = vpop.eup %2765  ;;  %v835_v40 = vmul.f32 1.442695, %v832_v38 }
 0x436   : > { %v837_v41 = vsel %vm824_vm13, %v2766_v39, 0.0 }
 0x437   : > { %2767 = vpow2.f32 %v835_v40  ;;  %838 = vadd.xlane.f32.xlu2 %v837_v41 }
 0x43d   : > { %v2768_v42 = vpop.eup %2767 }
 0x43e   : > { %v840_v43 = vsel %vm824_vm13, %v2768_v42, 0.0 }
 0x43f   : > { %841 = vadd.xlane.f32.xlu1 %v840_v43 }
 0x445   : > { %v883_v57 = vpop.permute.xlu0 %882 }
 0x44d   : > { %v1041_v60 = vpop.permute.xlu0 %1040 }
 0x44f   : > { %2702 = vrot.lane.b32.xlu2 %v3197_v44, %s3725_s23 }
 0x455   : > { %v1176_v63 = vpop.permute.xlu0 %1175 }
 0x457   : > { %888 = vrot.lane.b32.xlu2 %v776_v17, %s3723_s20 }
 0x458   : > { %1044 = vrot.lane.b32.xlu1 %v773_v15, %s3719_s25 }
 0x45d   : > { %v1172_v2 = vpop.permute.xlu0 %1171 }
 0x45f   : > { %886 = vrot.lane.b32.xlu2 %v773_v15, %s3723_s20  ;;  %s3756_s20 = smov 104  }
 0x467   : > { %884 = vrot.lane.b32.xlu2 %v776_v17, %s3721_s2  ;;  %s3754_s2 = smov 80  }
 0x46f   : > { %1046 = vrot.lane.b32.xlu2 %v776_v17, %s3719_s25  ;;  %s3757_s25 = smov 72  }
 0x477   : > { %1177 = vrot.lane.b32.xlu2 %v776_v17, %s3712_s3  ;;  %s3750_s3 = smov 96  }
 0x47f   : > { %1042 = vrot.lane.b32.xlu2 %v776_v17, %s3717_s0  ;;  %s3755_s0 = smov 112  }
 0x487   : > { %1173 = vrot.lane.b32.xlu2 %v776_v17, %s3715_s22  ;;  %s3752_s22 = smov 88  }
 0x4aa   : > { %v839_v45 = vpop.xlane.xlu2 %838 }
 0x4ab   : > { %2769 = vrcp.f32 %v839_v45 }
 0x4b1   : > { %v2770_v49 = vpop.eup %2769 }
 0x4b2   : > { %v2703_v47 = vpop.permute.xlu2 %2702  ;;  %v842_v48 = vpop.xlane.xlu1 %841  ;;  %v845_v52 = vmul.f32 %v2770_v49, %v2766_v39 }
 0x4b3   : > { %v2704_v50 = vunpack.i.l.bf16 %v2703_v47  ;;  %2771 = vrcp.f32 %v842_v48  ;;  %v2705_v51 = vunpack.i.h.bf16 %v2703_v47 }
 0x4b5   : > { %873 = vmatpush.msra.mxu3 %v2704_v50 }
 0x4b7   : > { %874 = vmatpush.msra.mxu3 %v2705_v51 }
 0x4b8   : > { %2526 = vmatmul.msk.f32.vlgmr.msra.gmra.mxu3 %vm824_vm13, %v845_v52 }
 0x4b9   : > { %v2772_v54 = vpop.eup %2771 }
 0x4ba   : > { %v889_v53 = vpop.permute.xlu2 %888  ;;  %v846_v55 = vmul.f32 %v2772_v54, %v2768_v42 }
 0x4bb   : > { %2528 = vmatpush.xpose.msk.msrb.mxu3 %vm788_vm11, %v889_v53 }
 0x4c0   : > { %2527 = vmatmul.msk.f32.gmra.mxu3 %vm824_vm13, %v846_v55 }
 0x4c2   : > { %v887_v56 = vpop.permute.xlu2 %886 }
 0x4c3   : > { %2529 = vmatpush.xpose.msk.msrb.mxu3 %vm788_vm11, %v887_v56 }
 0x4c7   : > { %2645 = vmatpush.msra.mxu3 %v778_v46 }
 0x4c8   : > { %2530 = vmatmul.msk.f32.vlgmr.msrb.gmra.mxu3 %vm788_vm11, %v883_v57 }
 0x4ca   : > { %v885_v58 = vpop.permute.xlu2 %884  ;;  %v1045_v61 = vpop.permute.xlu1 %1044 }
 0x4d0   : > { %2531 = vmatmul.msk.f32.gmra.mxu3 %vm788_vm11, %v885_v58 }
 0x4d2   : > { %v1047_v59 = vpop.permute.xlu2 %1046 }
 0x4d3   : > { %2538 = vmatpush.xpose.msk.msrb.mxu3 %vm788_vm11, %v1047_v59 }
 0x4d7   : > { %2539 = vmatpush.xpose.msk.msrb.mxu3 %vm788_vm11, %v1045_v61 }
 0x4da   : > { %v1178_v62 = vpop.permute.xlu2 %1177 }
 0x4db   : > { %2546 = vmatpush.xpose.msk.msra.mxu0 %vm788_vm11, %v1178_v62 }
 0x4df   : > { %2547 = vmatpush.xpose.msk.msra.mxu0 %vm788_vm11, %v1176_v63 }
 0x4e2   : > { %v1043_v1 = vpop.permute.xlu2 %1042 }
 0x4ea   : > { %v1174_v4 = vpop.permute.xlu2 %1173 }
 0x53b   : > { %v876_v0 = vpop.f32.mrf.mxu3 }
 0x53c   : > { %2536 = vmatmul.msk.f32.vlgmr.msrb.gmra.mxu0 %vm788_vm11, %v876_v0 }
 0x543   : > { %v879_v3 = vpop.f32.mrf.mxu3 }
 0x544   : > { %2537 = vmatmul.msk.f32.vlgmr.msra.gmra.mxu3 %vm788_vm11, %v879_v3  ;;  %2548 = vmatmul.msk.f32.vlgmr.msra.gmra.mxu0 %vm788_vm11, %v1172_v2 }
 0x54b   : > { %v915_v5 = vpop.f32.mrf.mxu3 }
 0x54c   : > { %v921_v6 = vmul.f32 0.35355338, %v915_v5  ;;  %2540 = vmatmul.msk.f32.vlgmr.msrb.gmra.mxu3 %vm788_vm11, %v1041_v60  ;;  %2549 = vmatmul.msk.f32.gmra.mxu0 %vm788_vm11, %v1174_v4 }
 0x54e   : > { %v923_v7 = vadd.f32 %v921_v6, %v3182_v23 }
 0x550   : > { %v925_v8 = vsel %vm824_vm13, %v923_v7, -inf }
 0x551   : > { %926 = vmax.xlane.f32.xlu1 %v925_v8 }
 0x553   : > { %v918_v9 = vpop.f32.mrf.mxu3 }
 0x554   : > { %v922_v10 = vmul.f32 0.35355338, %v918_v9  ;;  %2541 = vmatmul.msk.f32.gmra.mxu3 %vm788_vm11, %v1043_v1 }
 0x556   : > { %v924_v13 = vadd.f32 %v922_v10, %v3187_v30 }
 0x558   : > { %v928_v14 = vsel %vm824_vm13, %v924_v13, -inf }
 0x559   : > { %929 = vmax.xlane.f32.xlu0 %v928_v14 }
 0x5b9   : > { %v3232_v15 = vpop.f32.mrf.mxu0 }
 0x5c1   : > { %v1204_v16 = vpop.f32.mrf.mxu0 }
 0x5c2   : > { %v1210_v17 = vmul.f32 0.35355338, %v1204_v16 }
 0x5c4   : > { %v927_v18 = vpop.xlane.xlu1 %926  ;;  %v1212_v19 = vadd.f32 %v1210_v17, %v3182_v23 }
 0x5c5   : > { %v931_v21 = vsub.f32 %v923_v7, %v927_v18 }
 0x5c6   : > { %v1214_v22 = vsel %vm824_vm13, %v1212_v19, -inf }
 0x5c7   : > { %v933_v25 = vmul.f32 1.442695, %v931_v21  ;;  %v3236_v26 = vpop.f32.mrf.mxu3  ;;  %1215 = vmax.xlane.f32.xlu1 %v1214_v22  ;;  %v779_v22 = vld [vmem:[%s3688_s8 + $0x8] sm:$0xff] }
 0x5c8   : > { %1003 = vmatpush.msra.mxu2 %v779_v22 }
 0x5c9   : > { %2773 = vpow2.f32 %v933_v25  ;;  %v1207_v33 = vpop.f32.mrf.mxu0 }
 0x5ca   : > { %v1211_v35 = vmul.f32 0.35355338, %v1207_v33 }
 0x5cc   : > { %v930_v29 = vpop.xlane.xlu0 %929  ;;  %v1213_v40 = vadd.f32 %v1211_v35, %v3187_v30 }
 0x5cd   : > { %v932_v12 = vsub.f32 %v924_v13, %v930_v29 }
 0x5ce   : > { %v1217_v43 = vsel %vm824_vm13, %v1213_v40, -inf }
 0x5cf   : > { %v3238_v27 = vpop.eup %2773  ;;  %v1073_v28 = vpop.f32.mrf.mxu3  ;;  %v935_v37 = vmul.f32 1.442695, %v932_v12 }
 0x5d0   : > { %v1079_v31 = vmul.f32 0.35355338, %v1073_v28  ;;  %v937_v11 = vsel %vm824_vm13, %v3238_v27, 0.0 }
 0x5d1   : > { %938 = vadd.xlane.f32.xlu1 %v937_v11  ;;  %2775 = vpow2.f32 %v935_v37 }
 0x5d2   : > { %v1081_v34 = vadd.f32 %v1079_v31, %v3182_v23 }
 0x5d4   : > { %v1083_v36 = vsel %vm824_vm13, %v1081_v34, -inf }
 0x5d5   : > { %1084 = vmax.xlane.f32.xlu2 %v1083_v36 }
 0x5d7   : > { %v1076_v38 = vpop.f32.mrf.mxu3  ;;  %v2776_v45 = vpop.eup %2775 }
 0x5d8   : > { %v1080_v39 = vmul.f32 0.35355338, %v1076_v38  ;;  %v940_v46 = vsel %vm824_vm13, %v2776_v45, 0.0 }
 0x5da   : > { %v1082_v41 = vadd.f32 %v1080_v39, %v3187_v30  ;;  %v781_v39 = vld [vmem:[%s3688_s8 + $0x18] sm:$0xff] }
 0x5dc   : > { %v1086_v42 = vsel %vm824_vm13, %v1082_v41, -inf }
 0x5dd   : > { %1087 = vmax.xlane.f32.xlu0 %v1086_v42  ;;  %1218 = vmax.xlane.f32.xlu2 %v1217_v43 }
 0x5e5   : > { %941 = vadd.xlane.f32.xlu2 %v940_v46 }
 0x5f1   : > { %2707 = vrot.lane.b32.xlu0 %v3197_v44, %s3711_s26  ;;  %s3751_s26 = smov 64  }
 0x5f9   : > { %2717 = vrot.lane.b32.xlu0 %v3197_v44, %s3710_s27  ;;  %s3714_s27 = smov 48  }
 0x63a   : > { %v1216_v47 = vpop.xlane.xlu1 %1215 }
 0x63b   : > { %v1220_v48 = vsub.f32 %v1212_v19, %v1216_v47 }
 0x63d   : > { %v1222_v49 = vmul.f32 1.442695, %v1220_v48 }
 0x63f   : > { %2777 = vpow2.f32 %v1222_v49 }
 0x644   : > { %v939_v63 = vpop.xlane.xlu1 %938 }
 0x645   : > { %v2778_v50 = vpop.eup %2777 }
 0x646   : > { %v1226_v51 = vsel %vm824_vm13, %v2778_v50, 0.0 }
 0x647   : > { %1227 = vadd.xlane.f32.xlu2 %v1226_v51 }
 0x648   : > { %v1085_v52 = vpop.xlane.xlu2 %1084 }
 0x649   : > { %v1089_v53 = vsub.f32 %v1081_v34, %v1085_v52 }
 0x64b   : > { %v1091_v54 = vmul.f32 1.442695, %v1089_v53  ;;  %v2744_v53 = vld [vmem:[%s3689_s9] ss:$0 sm:$0xff] }
 0x64d   : > { %2779 = vpow2.f32 %v1091_v54 }
 0x650   : > { %v1088_v55 = vpop.xlane.xlu0 %1087  ;;  %v1219_v56 = vpop.xlane.xlu2 %1218 }
 0x651   : > { %v1090_v57 = vsub.f32 %v1082_v41, %v1088_v55  ;;  %v1221_v60 = vsub.f32 %v1213_v40, %v1219_v56  ;;  %v780_v40 = vld [vmem:[%s3688_s8 + $0x10] sm:$0xff] }
 0x652   : > { %1161 = vmatpush.msrb.mxu2 %v780_v40 }
 0x653   : > { %v2780_v58 = vpop.eup %2779  ;;  %v1093_v59 = vmul.f32 1.442695, %v1090_v57  ;;  %v1224_v62 = vmul.f32 1.442695, %v1221_v60 }
 0x654   : > { %v1095_v61 = vsel %vm824_vm13, %v2780_v58, 0.0 }
 0x655   : > { %1096 = vadd.xlane.f32.xlu1 %v1095_v61  ;;  %2781 = vpow2.f32 %v1093_v59 }
 0x656   : > { %2783 = vpow2.f32 %v1224_v62 }
 0x657   : > { %2785 = vrcp.f32 %v939_v63 }
 0x658   : > { %v942_v3 = vpop.xlane.xlu2 %941 }
 0x659   : > { %2787 = vrcp.f32 %v942_v3 }
 0x65b   : > { %v2782_v0 = vpop.eup %2781 }
 0x65c   : > { %v1098_v1 = vsel %vm824_vm13, %v2782_v0, 0.0  ;;  %v2784_v2 = vpop.eup %2783 }
 0x65d   : > { %1099 = vadd.xlane.f32.xlu2 %v1098_v1  ;;  %v2786_v5 = vpop.eup %2785  ;;  %v1229_v7 = vsel %vm824_vm13, %v2784_v2, 0.0 }
 0x65e   : > { %v945_v9 = vmul.f32 %v2786_v5, %v3238_v27 }
 0x65f   : > { %v2788_v13 = vpop.eup %2787 }
 0x660   : > { %v946_v17 = vmul.f32 %v2788_v13, %v2776_v45 }
 0x663   : > { %v2708_v4 = vpop.permute.xlu0 %2707 }
 0x664   : > { %v2709_v6 = vunpack.i.l.bf16 %v2708_v4  ;;  %v2710_v8 = vunpack.i.h.bf16 %v2708_v4 }
 0x665   : > { %1230 = vadd.xlane.f32.xlu2 %v1229_v7  ;;  %v1369_v7 = vld [vmem:[%s3692_s12 + $0x18] sm:$0xff] }
 0x666   : > { %973 = vmatpush.msrb.mxu1 %v2709_v6 }
 0x668   : > { %974 = vmatpush.msrb.mxu1 %v2710_v8  ;;  %v1368_v8 = vld [vmem:[%s3692_s12 + $0x10] sm:$0xff] }
 0x669   : > { %2532 = vmatmul.msk.f32.vlgmr.msrb.gmra.mxu1 %vm824_vm13, %v945_v9  ;;  %v1367_v9 = vld [vmem:[%s3692_s12 + $0x8] sm:$0xff] }
 0x66b   : > { %v2718_v10 = vpop.permute.xlu0 %2717 }
 0x66c   : > { %v2719_v14 = vunpack.i.l.bf16 %v2718_v10  ;;  %v2720_v16 = vunpack.i.h.bf16 %v2718_v10  ;;  %v1366_v10 = vld [vmem:[%s3692_s12] sm:$0xff] }
 0x66e   : > { %2712 = vrot.lane.b32.xlu1 %v3197_v44, %s3714_s27  ;;  %1262 = vmatpush.msra.mxu3 %v2719_v14  ;;  %s3753_s27 = smov 120  }
 0x670   : > { %1263 = vmatpush.msra.mxu3 %v2720_v16 }
 0x671   : > { %2533 = vmatmul.msk.f32.gmra.mxu1 %vm824_vm13, %v946_v17 }
 0x6ba   : > { %v1228_v18 = vpop.xlane.xlu2 %1227 }
 0x6bb   : > { %2789 = vrcp.f32 %v1228_v18 }
 0x6c1   : > { %v2790_v19 = vpop.eup %2789 }
 0x6c2   : > { %v1234_v21 = vmul.f32 %v2790_v19, %v2778_v50 }
 0x6c4   : > { %2550 = vmatmul.msk.f32.vlgmr.msra.gmra.mxu3 %vm824_vm13, %v1234_v21 }
 0x6c8   : > { %v1097_v27 = vpop.xlane.xlu1 %1096 }
 0x6d0   : > { %v1100_v25 = vpop.xlane.xlu2 %1099 }
 0x6d8   : > { %v1231_v28 = vpop.xlane.xlu2 %1230 }
 0x6d9   : > { %2791 = vrcp.f32 %v1231_v28 }
 0x6da   : > { %2793 = vrcp.f32 %v1097_v27 }
 0x6db   : > { %2795 = vrcp.f32 %v1100_v25 }
 0x6df   : > { %v2792_v44 = vpop.eup %2791 }
 0x6e0   : > { %v2713_v29 = vpop.permute.xlu1 %2712  ;;  %v2794_v31 = vpop.eup %2793  ;;  %v1235_v33 = vmul.f32 %v2792_v44, %v2784_v2 }
 0x6e1   : > { %v2714_v11 = vunpack.i.l.bf16 %v2713_v29  ;;  %v2715_v34 = vunpack.i.h.bf16 %v2713_v29  ;;  %v1103_v12 = vmul.f32 %v2794_v31, %v2780_v58  ;;  %v2796_v36 = vpop.eup %2795 }
 0x6e2   : > { %2551 = vmatmul.msk.f32.gmra.mxu3 %vm824_vm13, %v1235_v33  ;;  %v1104_v37 = vmul.f32 %v2796_v36, %v2782_v0 }
 0x6e3   : > { %1131 = vmatpush.msra.mxu1 %v2714_v11  ;;  %v2745_v11 = vld [vmem:[%s3690_s10] ss:$0 sm:$0xff] }
 0x6e5   : > { %1132 = vmatpush.msra.mxu1 %v2715_v34 }
 0x6e6   : > { %v976_v35 = vpop.f32.mrf.mxu1  ;;  %2542 = vmatmul.msk.f32.vlgmr.msra.gmra.mxu1 %vm824_vm13, %v1103_v12 }
 0x6e7   : > { %2534 = vmatmul.msk.f32.vlgmr.msra.gmra.mxu2 %vm788_vm11, %v976_v35  ;;  %1292 = vmatpush.msrb.mxu1 %v781_v39  ;;  %v2746_v35 = vld [vmem:[%s3691_s11] ss:$0 sm:$0xff] }
 0x6e8   : > { %1392 = vmatpush.msra.mxu2 %v1369_v7 }
 0x6ea   : > { %1393 = vmatpush.msra.mxu2 %v1368_v8 }
 0x6ec   : > { %1394 = vmatpush.msra.mxu2 %v1367_v9 }
 0x6ee   : > { %v979_v38 = vpop.f32.mrf.mxu1  ;;  %2543 = vmatmul.msk.f32.gmra.mxu1 %vm824_vm13, %v1104_v37  ;;  %1395 = vmatpush.msra.mxu2 %v1366_v10 }
 0x6ef   : > { %2535 = vmatmul.msk.f32.gmra.mxu2 %vm788_vm11, %v979_v38 }
 0x747   : > { %v1265_v41 = vpop.f32.mrf.mxu3 }
 0x748   : > { %2552 = vmatmul.msk.f32.vlgmr.msrb.gmra.mxu1 %vm788_vm11, %v1265_v41 }
 0x763   : > { %v1134_v42 = vpop.f32.mrf.mxu1 }
 0x764   : > { %2544 = vmatmul.msk.f32.vlgmr.msrb.gmra.mxu2 %vm788_vm11, %v1134_v42 }
 0x765   : > { %v1268_v43 = vpop.f32.mrf.mxu3 }
 0x766   : > { %2553 = vmatmul.msk.f32.gmra.mxu1 %vm788_vm11, %v1268_v43 }
 0x76a   : > { %v1005_v46 = vpop.f32.mrf.mxu2 }
 0x76b   : > { %v1137_v45 = vpop.f32.mrf.mxu1  ;;  %v1035_v48 = vadd.f32 %v3232_v15, %v1005_v46  ;;  %v1460_v46 = vld [vmem:[%s3694_s14 + $0x78] sm:$0xff] }
 0x76c   : > { %2545 = vmatmul.msk.f32.gmra.mxu2 %vm788_vm11, %v1137_v45  ;;  %1461 = vmatpush.msrb.mxu0 %v1460_v46 }
 0x772   : > { %v1008_v47 = vpop.f32.mrf.mxu2 }
 0x773   : > { %v1038_v55 = vadd.f32 %v3236_v26, %v1008_v47  ;;  %v1459_v47 = vld [vmem:[%s3694_s14 + $0x70] sm:$0xff] }
 0x774   : > { %1462 = vmatpush.msrb.mxu0 %v1459_v47 }
 0x7c5   : > { %v1294_v51 = vpop.f32.mrf.mxu1 }
 0x7e3   : > { %v1297_v15 = vpop.f32.mrf.mxu1 }
 0x7e7   : > { %v1163_v49 = vpop.f32.mrf.mxu2 }
 0x7e8   : > { %v1169_v50 = vadd.f32 %v1163_v49, %v1035_v48  ;;  %v1458_v48 = vld [vmem:[%s3694_s14 + $0x68] sm:$0xff]  ;;  %v1457_v49 = vld [vmem:[%s3694_s14 + $0x60] sm:$0xff] }
 0x7e9   : > { %1463 = vmatpush.msrb.mxu0 %v1458_v48 }
 0x7ea   : > { %v1300_v52 = vadd.f32 %v1294_v51, %v1169_v50  ;;  %v1456_v50 = vld [vmem:[%s3694_s14 + $0x58] sm:$0xff]  ;;  %v1455_v51 = vld [vmem:[%s3694_s14 + $0x50] sm:$0xff] }
 0x7eb   : > { %1464 = vmatpush.msrb.mxu0 %v1457_v49 }
 0x7ec   : > { %v1302_v54 = vadd.f32 %v1300_v52, %v3130_v20  ;;  %v1454_v52 = vld [vmem:[%s3694_s14 + $0x48] sm:$0xff] }
 0x7ed   : > { %1465 = vmatpush.msrb.mxu0 %v1456_v50 }
 0x7ee   : > { %v3287_v56 = vadd.f32 %v2744_v53, %v1302_v54  ;;  %v1452_v54 = vld [vmem:[%s3694_s14 + $0x38] sm:$0xff] }
 0x7ef   : > { %v1166_v57 = vpop.f32.mrf.mxu2  ;;  %1466 = vmatpush.msrb.mxu0 %v1455_v51 }
 0x7f0   : > { %v1170_v58 = vadd.f32 %v1166_v57, %v1038_v55  ;;  %v1312_v59 = vsel %vm679_vm3, %v3287_v56, 0.0  ;;  %v1451_v55 = vld [vmem:[%s3694_s14 + $0x30] sm:$0xff]  ;;  %v1450_v57 = vld [vmem:[%s3694_s14 + $0x28] sm:$0xff] }
 0x7f1   : > { %1313 = vadd.xlane.f32.xlu0 %v1312_v59  ;;  %1467 = vmatpush.msrb.mxu0 %v1454_v52  ;;  %v1448_v59 = vld [vmem:[%s3694_s14 + $0x18] sm:$0xff] }
 0x7f2   : > { %v1301_v60 = vadd.f32 %v1297_v15, %v1170_v58  ;;  %v1449_v58 = vld [vmem:[%s3694_s14 + $0x20] sm:$0xff] }
 0x7f3   : > { %v2747_v15 = vld [vmem:[%s3693_s13] ss:$0 sm:$0xff] }
 0x7f4   : > { %v1303_v61 = vadd.f32 %v1301_v60, %v3137_v24  ;;  %v1447_v60 = vld [vmem:[%s3694_s14 + $0x10] sm:$0xff] }
 0x7f6   : > { %v3292_v62 = vadd.f32 %v2744_v53, %v1303_v61  ;;  %v1453_v53 = vld [vmem:[%s3694_s14 + $0x40] sm:$0xff] }
 0x7f7   : > { %1468 = vmatpush.msrb.mxu0 %v1453_v53 }
 0x7f8   : > { %v1315_v63 = vsel %vm679_vm3, %v3292_v62, 0.0 }
 0x7f9   : > { %1316 = vadd.xlane.f32.xlu2 %v1315_v63  ;;  %1469 = vmatpush.msrb.mxu0 %v1452_v54  ;;  %v1446_v63 = vld [vmem:[%s3694_s14 + $0x8] sm:$0xff] }
 0x7fb   : > { %1470 = vmatpush.msrb.mxu0 %v1451_v55  ;;  %v2563_v55 = vld [vmem:[%s3747_s6 + $0x38] sm:$0xff] }
 0x7fc   : > { %1578 = vmatpush.msrb.mxu3 %v2563_v55 }
 0x7fd   : > { %1471 = vmatpush.msrb.mxu0 %v1450_v57  ;;  %v2562_v57 = vld [vmem:[%s3747_s6 + $0x30] sm:$0xff] }
 0x7fe   : > { %1579 = vmatpush.msrb.mxu3 %v2562_v57 }
 0x7ff   : > { %1472 = vmatpush.msrb.mxu0 %v1449_v58  ;;  %v2561_v58 = vld [vmem:[%s3747_s6 + $0x28] sm:$0xff] }
 0x800   : > { %1580 = vmatpush.msrb.mxu3 %v2561_v58 }
 0x801   : > { %1473 = vmatpush.msrb.mxu0 %v1448_v59  ;;  %v2560_v59 = vld [vmem:[%s3747_s6 + $0x20] sm:$0xff] }
 0x802   : > { %1581 = vmatpush.msrb.mxu3 %v2560_v59 }
 0x803   : > { %1474 = vmatpush.msrb.mxu0 %v1447_v60 }
 0x805   : > { %1475 = vmatpush.msrb.mxu0 %v1446_v63 }
 0x864   : > { %v1314_v20 = vpop.xlane.xlu0 %1313 }
 0x865   : > { %v1318_v26 = vmul.f32 %v1314_v20, %v3141_v32 }
 0x867   : > { %v1320_v0 = vsub.f32 %v3287_v56, %v1318_v26  ;;  %v1445_v26 = vld [vmem:[%s3694_s14] sm:$0xff] }
 0x868   : > { %1476 = vmatpush.msrb.mxu0 %v1445_v26 }
 0x869   : > { %v1322_v1 = vmul.f32 %v1320_v0, %v1320_v0 }
 0x86b   : > { %v1324_v2 = vsel %vm679_vm3, %v1322_v1, 0.0 }
 0x86c   : > { %1325 = vadd.xlane.f32.xlu1 %v1324_v2  ;;  %v1317_v3 = vpop.xlane.xlu2 %1316 }
 0x86d   : > { %v1319_v4 = vmul.f32 %v1317_v3, %v3141_v32 }
 0x86f   : > { %v1321_v24 = vsub.f32 %v3292_v62, %v1319_v4 }
 0x871   : > { %v1323_v5 = vmul.f32 %v1321_v24, %v1321_v24 }
 0x873   : > { %v1327_v6 = vsel %vm679_vm3, %v1323_v5, 0.0 }
 0x874   : > { %1328 = vadd.xlane.f32.xlu2 %v1327_v6 }
 0x8df   : > { %v1326_v13 = vpop.xlane.xlu1 %1325 }
 0x8e0   : > { %v1330_v14 = vmul.f32 %v1326_v13, %v3141_v32 }
 0x8e2   : > { %v1332_v16 = vadd.f32 1e-05, %v1330_v14 }
 0x8e4   : > { %2797 = vrsqrt.f32 %v1332_v16  ;;  %vm1340_vm0 = vweird.f32 %v1332_v16 }
 0x8e7   : > { %v1329_v17 = vpop.xlane.xlu2 %1328 }
 0x8e8   : > { %v1331_v18 = vmul.f32 %v1329_v17, %v3141_v32 }
 0x8ea   : > { %v2798_v19 = vpop.eup %2797  ;;  %v1333_v21 = vadd.f32 1e-05, %v1331_v18 }
 0x8eb   : > { %v1335_v22 = vmul.f32 %v2798_v19, %v1332_v16  ;;  %vm1341_vm15 = vweird.f32 %v2798_v19 }
 0x8ec   : > { %2799 = vrsqrt.f32 %v1333_v21  ;;  %vm1342_vm1 = vmor %vm1340_vm0, %vm1341_vm15  ;;  %vm1350_vm4 = vweird.f32 %v1333_v21 }
 0x8ed   : > { %v1336_v25 = vmul.f32 %v2798_v19, %v1335_v22 }
 0x8ef   : > { %v1337_v27 = vmul.f32 0.5, %v1336_v25 }
 0x8f1   : > { %v1338_v28 = vsub.f32 1.5, %v1337_v27 }
 0x8f2   : > { %v2800_v44 = vpop.eup %2799 }
 0x8f3   : > { %v1339_v29 = vmul.f32 %v2798_v19, %v1338_v28  ;;  %v1345_v31 = vmul.f32 %v2800_v44, %v1333_v21  ;;  %vm1351_vm2 = vweird.f32 %v2800_v44 }
 0x8f4   : > { %vm1352_vm5 = vmor %vm1350_vm4, %vm1351_vm2 }
 0x8f5   : > { %v1343_v33 = vsel %vm1342_vm1, %v2798_v19, %v1339_v29  ;;  %v1346_v34 = vmul.f32 %v2800_v44, %v1345_v31 }
 0x8f6   : > { %v1354_v12 = vmul.f32 %v1343_v33, %v1320_v0 }
 0x8f7   : > { %v1347_v36 = vmul.f32 0.5, %v1346_v34 }
 0x8f8   : > { %v1359_v37 = vmul.f32 %v2745_v11, %v1354_v12 }
 0x8f9   : > { %v1348_v38 = vsub.f32 1.5, %v1347_v36 }
 0x8fa   : > { %v1364_v39 = vadd.f32 %v2746_v35, %v1359_v37  ;;  %v2748_v37 = vld [vmem:[%s3695_s15] ss:$0 sm:$0xff] }
 0x8fb   : > { %v1349_v40 = vmul.f32 %v2800_v44, %v1348_v38 }
 0x8fc   : > { %2554 = vmatmul.msk.f32.vlgmr.msra.gmra.mxu2 %vm679_vm3, %v1364_v39 }
 0x8fd   : > { %v1353_v41 = vsel %vm1352_vm5, %v2800_v44, %v1349_v40 }
 0x8fe   : > { %v1355_v42 = vmul.f32 %v1353_v41, %v1321_v24 }
 0x900   : > { %v1360_v43 = vmul.f32 %v2745_v11, %v1355_v42 }
 0x902   : > { %v1365_v45 = vadd.f32 %v2746_v35, %v1360_v43 }
 0x904   : > { %2555 = vmatmul.msk.f32.gmra.mxu2 %vm679_vm3, %v1365_v45 }
 0x97f   : > { %v1397_v61 = vpop.f32.mrf.mxu2 }
 0x980   : > { %v1398_v20 = vadd.f32 %v2747_v15, %v1397_v61 }
 0x982   : > { %v2556_v0 = vmul.f32 -1.702, %v1398_v20 }
 0x984   : > { %v1407_v1 = vmul.f32 1.442695, %v2556_v0 }
 0x986   : > { %2801 = vpow2.f32 %v1407_v1 }
 0x987   : > { %v1400_v2 = vpop.f32.mrf.mxu2 }
 0x988   : > { %v1401_v3 = vadd.f32 %v2747_v15, %v1400_v2 }
 0x98a   : > { %v2557_v4 = vmul.f32 -1.702, %v1401_v3 }
 0x98c   : > { %v2802_v24 = vpop.eup %2801  ;;  %v1409_v5 = vmul.f32 1.442695, %v2557_v4 }
 0x98d   : > { %v1411_v6 = vadd.f32 1.0, %v2802_v24 }
 0x98e   : > { %2803 = vpow2.f32 %v1409_v5 }
 0x98f   : > { %2805 = vrcp.f32 %v1411_v6  ;;  %v1424_v14 = vand.u32 2147483648, %v1411_v6  ;;  %v1422_v17 = vand.u32 2147483647, %v1411_v6  ;;  %vm1418_vm7 = vweird.f32 %v1411_v6 }
 0x991   : > { %v1425_v21 = vor.u32 1.1754944e-38, %v1424_v14  ;;  %vm1423_vm9 = vcmp.eq.f32.partialorder %v1422_v17, 8.507059e+37 }
 0x994   : > { %v2804_v7 = vpop.eup %2803 }
 0x995   : > { %v2806_v8 = vpop.eup %2805  ;;  %v1412_v9 = vadd.f32 1.0, %v2804_v7  ;;  %v2749_v7 = vld [vmem:[%s3748_s4 + $0x1] ss:$0 sm:$0xff] }
 0x996   : > { %v1414_v10 = vmul.f32 %v2806_v8, %v1411_v6  ;;  %vm1419_vm6 = vweird.f32 %v2806_v8 }
 0x997   : > { %2807 = vrcp.f32 %v1412_v9  ;;  %vm1420_vm8 = vmor %vm1418_vm7, %vm1419_vm6  ;;  %v1439_v29 = vand.u32 2147483648, %v1412_v9  ;;  %v1437_v11 = vand.u32 2147483647, %v1412_v9  ;;  %vm1433_vm12 = vweird.f32 %v1412_v9 }
 0x998   : > { %v1415_v13 = vsub.f32 1.0, %v1414_v10 }
 0x999   : > { %v1440_v34 = vor.u32 1.1754944e-38, %v1439_v29  ;;  %vm1438_vm15 = vcmp.eq.f32.partialorder %v1437_v11, 8.507059e+37 }
 0x99a   : > { %v1416_v16 = vmul.f32 %v2806_v8, %v1415_v13  ;;  %v2750_v13 = vld [vmem:[%s3749_s5 + $0x1] ss:$0 sm:$0xff] }
 0x99c   : > { %v1417_v18 = vadd.f32 %v2806_v8, %v1416_v16 }
 0x99d   : > { %v2808_v19 = vpop.eup %2807 }
 0x99e   : > { %v1421_v22 = vsel %vm1420_vm8, %v2806_v8, %v1417_v18  ;;  %v1429_v25 = vmul.f32 %v2808_v19, %v1412_v9  ;;  %vm1434_vm10 = vweird.f32 %v2808_v19 }
 0x99f   : > { %v1426_v27 = vsel %vm1423_vm9, %v1425_v21, %v1421_v22  ;;  %vm1435_vm14 = vmor %vm1433_vm12, %vm1434_vm10 }
 0x9a0   : > { %v1443_v28 = vmul.f32 %v1426_v27, %v1398_v20  ;;  %v1430_v44 = vsub.f32 1.0, %v1429_v25 }
 0x9a2   : > { %1477 = vmatmul.f32.vlgmr.msrb.gmra.mxu0 %v1443_v28  ;;  %v1431_v31 = vmul.f32 %v2808_v19, %v1430_v44  ;;  %v2751_v28 = vld [vmem:[%s3687_s7 + $0x1] ss:$0 sm:$0xff] }
 0x9a4   : > { %v1432_v33 = vadd.f32 %v2808_v19, %v1431_v31 }
 0x9a6   : > { %v1436_v12 = vsel %vm1435_vm14, %v2808_v19, %v1432_v33 }
 0x9a7   : > { %v1441_v35 = vsel %vm1438_vm15, %v1440_v34, %v1436_v12 }
 0x9a8   : > { %v1444_v36 = vmul.f32 %v1441_v35, %v1401_v3 }
 0x9aa   : > { %1480 = vmatmul.f32.gmra.mxu0 %v1444_v36 }
 0xa1f   : > { %v1478_v38 = vpop.f32.mrf.mxu0 }
 0xa20   : > { %v1484_v39 = vadd.f32 %v1478_v38, %v3287_v56 }
 0xa22   : > { %v3379_v40 = vadd.f32 %v2748_v37, %v1484_v39 }
 0xa24   : > { %v1496_v41 = vsel %vm679_vm3, %v3379_v40, 0.0 }
 0xa25   : > { %1497 = vadd.xlane.f32.xlu2 %v1496_v41 }
 0xa27   : > { %v1481_v42 = vpop.f32.mrf.mxu0 }
 0xa28   : > { %v1485_v43 = vadd.f32 %v1481_v42, %v3292_v62 }
 0xa2a   : > { %v3384_v45 = vadd.f32 %v2748_v37, %v1485_v43 }
 0xa2c   : > { %v1499_v46 = vsel %vm679_vm3, %v3384_v45, 0.0 }
 0xa2d   : > { %1500 = vadd.xlane.f32.xlu2 %v1499_v46 }
 0xa98   : > { %v1498_v47 = vpop.xlane.xlu2 %1497 }
 0xa99   : > { %v1502_v48 = vmul.f32 %v1498_v47, %v3141_v32 }
 0xa9b   : > { %v1504_v56 = vsub.f32 %v3379_v40, %v1502_v48 }
 0xa9d   : > { %v1506_v49 = vmul.f32 %v1504_v56, %v1504_v56 }
 0xa9f   : > { %v1508_v50 = vsel %vm679_vm3, %v1506_v49, 0.0 }
 0xaa0   : > { %1509 = vadd.xlane.f32.xlu2 %v1508_v50  ;;  %v1501_v51 = vpop.xlane.xlu2 %1500 }
 0xaa1   : > { %v1503_v52 = vmul.f32 %v1501_v51, %v3141_v32 }
 0xaa3   : > { %v1505_v62 = vsub.f32 %v3384_v45, %v1503_v52 }
 0xaa5   : > { %v1507_v53 = vmul.f32 %v1505_v62, %v1505_v62 }
 0xaa7   : > { %v1511_v54 = vsel %vm679_vm3, %v1507_v53, 0.0 }
 0xaa8   : > { %1512 = vadd.xlane.f32.xlu0 %v1511_v54 }
 0xb13   : > { %v1510_v15 = vpop.xlane.xlu2 %1509 }
 0xb14   : > { %v1514_v60 = vmul.f32 %v1510_v15, %v3141_v32 }
 0xb16   : > { %v1516_v61 = vadd.f32 1e-05, %v1514_v60 }
 0xb18   : > { %2809 = vrsqrt.f32 %v1516_v61  ;;  %vm1524_vm1 = vweird.f32 %v1516_v61 }
 0xb1b   : > { %v1513_v63 = vpop.xlane.xlu0 %1512 }
 0xb1c   : > { %v1515_v20 = vmul.f32 %v1513_v63, %v3141_v32  ;;  %v2567_v63 = vld [vmem:[%s3688_s8 + $0x20] sm:$0xff] }
 0xb1d   : > { %1842 = vmatpush.msra.mxu0 %v2567_v63 }
 0xb1e   : > { %v2810_v26 = vpop.eup %2809  ;;  %v1517_v0 = vadd.f32 1e-05, %v1515_v20 }
 0xb1f   : > { %v1519_v1 = vmul.f32 %v2810_v26, %v1516_v61  ;;  %vm1525_vm0 = vweird.f32 %v2810_v26 }
 0xb20   : > { %2811 = vrsqrt.f32 %v1517_v0  ;;  %vm1526_vm2 = vmor %vm1524_vm1, %vm1525_vm0  ;;  %vm1534_vm5 = vweird.f32 %v1517_v0 }
 0xb21   : > { %v1520_v2 = vmul.f32 %v2810_v26, %v1519_v1 }
 0xb23   : > { %v1521_v3 = vmul.f32 0.5, %v1520_v2 }
 0xb25   : > { %v1522_v4 = vsub.f32 1.5, %v1521_v3 }
 0xb26   : > { %v2812_v24 = vpop.eup %2811 }
 0xb27   : > { %v1523_v5 = vmul.f32 %v2810_v26, %v1522_v4  ;;  %v1529_v6 = vmul.f32 %v2812_v24, %v1517_v0  ;;  %vm1535_vm4 = vweird.f32 %v2812_v24 }
 0xb28   : > { %vm1536_vm6 = vmor %vm1534_vm5, %vm1535_vm4 }
 0xb29   : > { %v1527_v8 = vsel %vm1526_vm2, %v2810_v26, %v1523_v5  ;;  %v1530_v9 = vmul.f32 %v2812_v24, %v1529_v6 }
 0xb2a   : > { %v1538_v10 = vmul.f32 %v1527_v8, %v1504_v56 }
 0xb2b   : > { %v1531_v14 = vmul.f32 0.5, %v1530_v9 }
 0xb2c   : > { %v1543_v16 = vmul.f32 %v2749_v7, %v1538_v10 }
 0xb2d   : > { %v1532_v17 = vsub.f32 1.5, %v1531_v14 }
 0xb2e   : > { %v1548_v18 = vadd.f32 %v2750_v13, %v1543_v16 }
 0xb2f   : > { %v1533_v19 = vmul.f32 %v2812_v24, %v1532_v17 }
 0xb30   : > { %2565 = vmatmul.msk.f32.vlgmr.msrb.gmra.mxu3 %vm679_vm3, %v1548_v18 }
 0xb31   : > { %v1537_v21 = vsel %vm1536_vm6, %v2812_v24, %v1533_v19 }
 0xb32   : > { %v1539_v22 = vmul.f32 %v1537_v21, %v1505_v62 }
 0xb34   : > { %v1544_v25 = vmul.f32 %v2749_v7, %v1539_v22 }
 0xb36   : > { %v1549_v27 = vadd.f32 %v2750_v13, %v1544_v25 }
 0xb38   : > { %2566 = vmatmul.msk.f32.gmra.mxu3 %vm679_vm3, %v1549_v27 }
 0xbb3   : > { %v1583_v44 = vpop.f32.mrf.mxu3 }
 0xbb4   : > { %v1584_v29 = vadd.f32 %v2751_v28, %v1583_v44 }
 0xbb6   : > { %1596 = vrot.lane.b32.xlu0 %v1584_v29, %s3750_s3 }
 0xbbb   : > { %v1586_v31 = vpop.f32.mrf.mxu3 }
 0xbbc   : > { %v1587_v11 = vadd.f32 %v2751_v28, %v1586_v31 }
 0xbbe   : > { %1598 = vrot.lane.b32.xlu2 %v1587_v11, %s3750_s3  ;;  %v3421_v33 = vpack.i.bf16 %v1584_v29, %v1587_v11  ;;  %s3758_s3 = smov 56  }
 0xbc6   : > { %2722 = vrot.lane.b32.xlu2 %v3421_v33, %s3751_s26  ;;  %s3759_s26 = smov 40  }
 0xbce   : > { %1696 = vrot.lane.b32.xlu2 %v1584_v29, %s3752_s22 }
 0xbd6   : > { %1692 = vrot.lane.b32.xlu2 %v1584_v29, %s3753_s27 }
 0xbde   : > { %1694 = vrot.lane.b32.xlu2 %v1587_v11, %s3753_s27 }
 0xbe6   : > { %1856 = vrot.lane.b32.xlu2 %v1587_v11, %s3754_s2 }
 0xbee   : > { %1850 = vrot.lane.b32.xlu2 %v1584_v29, %s3755_s0 }
 0xbf6   : > { %1852 = vrot.lane.b32.xlu2 %v1587_v11, %s3755_s0 }
 0xbfe   : > { %1983 = vrot.lane.b32.xlu2 %v1587_v11, %s3756_s20 }
 0xc18   : > { %v1599_v34 = vpop.permute.xlu2 %1598 }
 0xc19   : > { %2571 = vmatpush.xpose.msk.msra.mxu1 %vm788_vm11, %v1599_v34 }
 0xc20   : > { %v2723_v12 = vpop.permute.xlu2 %2722 }
 0xc21   : > { %v2724_v35 = vunpack.i.l.bf16 %v2723_v12  ;;  %v2725_v36 = vunpack.i.h.bf16 %v2723_v12 }
 0xc23   : > { %1683 = vmatpush.msrb.mxu2 %v2724_v35 }
 0xc25   : > { %1684 = vmatpush.msrb.mxu2 %v2725_v36 }
 0xc28   : > { %v1597_v37 = vpop.permute.xlu0 %1596  ;;  %v1697_v58 = vpop.permute.xlu2 %1696 }
 0xc29   : > { %2572 = vmatpush.xpose.msk.msra.mxu1 %vm788_vm11, %v1597_v37 }
 0xc2c   : > { %2573 = vmatmul.msk.f32.vlgmr.msra.gmra.mxu1 %vm788_vm11, %v1584_v29 }
 0xc30   : > { %v1693_v20 = vpop.permute.xlu2 %1692 }
 0xc34   : > { %2574 = vmatmul.msk.f32.gmra.mxu1 %vm788_vm11, %v1587_v11 }
 0xc38   : > { %v1695_v1 = vpop.permute.xlu2 %1694 }
 0xc40   : > { %v1857_v3 = vpop.permute.xlu2 %1856 }
 0xc48   : > { %v1851_v6 = vpop.permute.xlu2 %1850 }
 0xc50   : > { %v1853_v7 = vpop.permute.xlu2 %1852 }
 0xc58   : > { %v1984_v16 = vpop.permute.xlu2 %1983 }
 0xca9   : > { %v1625_v38 = vpop.f32.mrf.mxu1 }
 0xcaa   : > { %v1631_v39 = vmul.f32 0.35355338, %v1625_v38 }
 0xcac   : > { %v1633_v41 = vadd.f32 %v1631_v39, %v3182_v23 }
 0xcae   : > { %v1635_v42 = vsel %vm824_vm13, %v1633_v41, -inf }
 0xcaf   : > { %1636 = vmax.xlane.f32.xlu1 %v1635_v42 }
 0xcb1   : > { %v1628_v43 = vpop.f32.mrf.mxu1 }
 0xcb2   : > { %v1632_v46 = vmul.f32 0.35355338, %v1628_v43 }
 0xcb4   : > { %v1634_v47 = vadd.f32 %v1632_v46, %v3187_v30 }
 0xcb6   : > { %v1638_v48 = vsel %vm824_vm13, %v1634_v47, -inf }
 0xcb7   : > { %1639 = vmax.xlane.f32.xlu1 %v1638_v48 }
 0xd22   : > { %v1637_v56 = vpop.xlane.xlu1 %1636 }
 0xd23   : > { %v1641_v49 = vsub.f32 %v1633_v41, %v1637_v56 }
 0xd25   : > { %v1643_v50 = vmul.f32 1.442695, %v1641_v49 }
 0xd27   : > { %2813 = vpow2.f32 %v1643_v50 }
 0xd2a   : > { %v1640_v51 = vpop.xlane.xlu1 %1639 }
 0xd2b   : > { %v1642_v52 = vsub.f32 %v1634_v47, %v1640_v51 }
 0xd2d   : > { %v2814_v62 = vpop.eup %2813  ;;  %v1645_v53 = vmul.f32 1.442695, %v1642_v52 }
 0xd2e   : > { %v1647_v54 = vsel %vm824_vm13, %v2814_v62, 0.0 }
 0xd2f   : > { %2815 = vpow2.f32 %v1645_v53  ;;  %1648 = vadd.xlane.f32.xlu1 %v1647_v54 }
 0xd35   : > { %v2816_v55 = vpop.eup %2815 }
 0xd36   : > { %v1650_v57 = vsel %vm824_vm13, %v2816_v55, 0.0 }
 0xd37   : > { %1651 = vadd.xlane.f32.xlu0 %v1650_v57 }
 0xd48   : > { %1698 = vrot.lane.b32.xlu1 %v1587_v11, %s3752_s22  ;;  %s3760_s22 = smov 48  }
 0xd4b   : > { %1985 = vrot.lane.b32.xlu0 %v1584_v29, %s3757_s25 }
 0xd50   : > { %1854 = vrot.lane.b32.xlu1 %v1584_v29, %s3754_s2 }
 0xd58   : > { %1987 = vrot.lane.b32.xlu1 %v1587_v11, %s3757_s25  ;;  %s2442_s25 = scalar_lea.hbm %s3699_s19, %s3063_s1 }
 0xd60   : > { %1981 = vrot.lane.b32.xlu1 %v1584_v29, %s3756_s20  ;;  %s2883_s20 = scalar_lea.hbm %s3699_s19, 2 }
 0xda2   : > { %v1649_v59 = vpop.xlane.xlu1 %1648 }
 0xda3   : > { %2817 = vrcp.f32 %v1649_v59 }
 0xda9   : > { %v2818_v15 = vpop.eup %2817 }
 0xdaa   : > { %v1655_v60 = vmul.f32 %v2818_v15, %v2814_v62  ;;  %v1652_v61 = vpop.xlane.xlu0 %1651 }
 0xdab   : > { %2819 = vrcp.f32 %v1652_v61 }
 0xdac   : > { %2575 = vmatmul.msk.f32.vlgmr.msrb.gmra.mxu2 %vm824_vm13, %v1655_v60 }
 0xdb1   : > { %v2820_v26 = vpop.eup %2819 }
 0xdb2   : > { %v1656_v0 = vmul.f32 %v2820_v26, %v2816_v55 }
 0xdb4   : > { %2576 = vmatmul.msk.f32.gmra.mxu2 %vm824_vm13, %v1656_v0 }
 0xdba   : > { %v1699_v2 = vpop.permute.xlu1 %1698 }
 0xdbb   : > { %2577 = vmatpush.xpose.msk.msra.mxu3 %vm788_vm11, %v1699_v2 }
 0xdbd   : > { %v1986_v5 = vpop.permute.xlu0 %1985 }
 0xdbf   : > { %2578 = vmatpush.xpose.msk.msra.mxu3 %vm788_vm11, %v1697_v58 }
 0xdc2   : > { %2579 = vmatmul.msk.f32.vlgmr.msra.gmra.mxu3 %vm788_vm11, %v1693_v20  ;;  %v1855_v4 = vpop.permute.xlu1 %1854 }
 0xdc3   : > { %2587 = vmatpush.xpose.msk.msrb.mxu3 %vm788_vm11, %v1857_v3 }
 0xdc7   : > { %2588 = vmatpush.xpose.msk.msrb.mxu3 %vm788_vm11, %v1855_v4 }
 0xdca   : > { %2580 = vmatmul.msk.f32.gmra.mxu3 %vm788_vm11, %v1695_v1  ;;  %v1988_v24 = vpop.permute.xlu1 %1987 }
 0xdcb   : > { %2595 = vmatpush.xpose.msk.msrb.mxu0 %vm788_vm11, %v1988_v24 }
 0xdcf   : > { %2596 = vmatpush.xpose.msk.msrb.mxu0 %vm788_vm11, %v1986_v5 }
 0xdd2   : > { %2589 = vmatmul.msk.f32.vlgmr.msrb.gmra.mxu3 %vm788_vm11, %v1851_v6  ;;  %v1982_v10 = vpop.permute.xlu1 %1981 }
 0xdda   : > { %2590 = vmatmul.msk.f32.gmra.mxu3 %vm788_vm11, %v1853_v7 }
 0xe2f   : > { %v1686_v8 = vpop.f32.mrf.mxu2 }
 0xe30   : > { %2585 = vmatmul.msk.f32.vlgmr.msra.gmra.mxu0 %vm788_vm11, %v1686_v8 }
 0xe37   : > { %v1689_v9 = vpop.f32.mrf.mxu2 }
 0xe38   : > { %2586 = vmatmul.msk.f32.gmra.mxu0 %vm788_vm11, %v1689_v9 }
 0xe40   : > { %2597 = vmatmul.msk.f32.vlgmr.msrb.gmra.mxu0 %vm788_vm11, %v1982_v10 }
 0xe45   : > { %v1725_v13 = vpop.f32.mrf.mxu3 }
 0xe46   : > { %v1731_v14 = vmul.f32 0.35355338, %v1725_v13 }
 0xe48   : > { %2598 = vmatmul.msk.f32.gmra.mxu0 %vm788_vm11, %v1984_v16  ;;  %v1733_v17 = vadd.f32 %v1731_v14, %v3182_v23 }
 0xe4a   : > { %v1735_v18 = vsel %vm824_vm13, %v1733_v17, -inf }
 0xe4b   : > { %1736 = vmax.xlane.f32.xlu1 %v1735_v18 }
 0xe4d   : > { %v1728_v19 = vpop.f32.mrf.mxu3 }
 0xe4e   : > { %v1732_v21 = vmul.f32 0.35355338, %v1728_v19 }
 0xe50   : > { %v1734_v22 = vadd.f32 %v1732_v21, %v3187_v30 }
 0xe52   : > { %v1738_v25 = vsel %vm824_vm13, %v1734_v22, -inf }
 0xe53   : > { %1739 = vmax.xlane.f32.xlu0 %v1738_v25 }
 0xe55   : > { %v1883_v27 = vpop.f32.mrf.mxu3 }
 0xe56   : > { %v1889_v28 = vmul.f32 0.35355338, %v1883_v27 }
 0xe58   : > { %v1891_v44 = vadd.f32 %v1889_v28, %v3182_v23 }
 0xe5a   : > { %v1893_v29 = vsel %vm824_vm13, %v1891_v44, -inf }
 0xe5b   : > { %1894 = vmax.xlane.f32.xlu2 %v1893_v29 }
 0xe5d   : > { %v1886_v31 = vpop.f32.mrf.mxu3 }
 0xe5e   : > { %v1890_v11 = vmul.f32 0.35355338, %v1886_v31 }
 0xe60   : > { %v1892_v34 = vadd.f32 %v1890_v11, %v3187_v30 }
 0xe62   : > { %v1896_v12 = vsel %vm824_vm13, %v1892_v34, -inf }
 0xe63   : > { %1897 = vmax.xlane.f32.xlu0 %v1896_v12 }
 0xe77   : > { %2727 = vrot.lane.b32.xlu0 %v3421_v33, %s3758_s3 }
 0xe7f   : > { %2737 = vrot.lane.b32.xlu0 %v3421_v33, %s3759_s26  ;;  %s3761_s26 = sld [smem:[#allocation13_spill]] }
 0xead   : > { %v3478_v35 = vpop.f32.mrf.mxu0 }
 0xeb5   : > { %v3480_v36 = vpop.f32.mrf.mxu0 }
 0xebd   : > { %v2014_v37 = vpop.f32.mrf.mxu0 }
 0xebe   : > { %v2020_v38 = vmul.f32 0.35355338, %v2014_v37  ;;  %v1737_v39 = vpop.xlane.xlu1 %1736  ;;  %v2568_v37 = vld [vmem:[%s3688_s8 + $0x28] sm:$0xff] }
 0xebf   : > { %v1741_v41 = vsub.f32 %v1733_v17, %v1737_v39  ;;  %1813 = vmatpush.msra.mxu2 %v2568_v37 }
 0xec0   : > { %v2022_v42 = vadd.f32 %v2020_v38, %v3182_v23 }
 0xec1   : > { %v1743_v43 = vmul.f32 1.442695, %v1741_v41 }
 0xec2   : > { %v2024_v46 = vsel %vm824_vm13, %v2022_v42, -inf }
 0xec3   : > { %2821 = vpow2.f32 %v1743_v43  ;;  %2025 = vmax.xlane.f32.xlu1 %v2024_v46 }
 0xec5   : > { %v2017_v47 = vpop.f32.mrf.mxu0 }
 0xec6   : > { %v2021_v48 = vmul.f32 0.35355338, %v2017_v47  ;;  %v1740_v56 = vpop.xlane.xlu0 %1739 }
 0xec7   : > { %v1742_v49 = vsub.f32 %v1734_v22, %v1740_v56 }
 0xec8   : > { %v2023_v50 = vadd.f32 %v2021_v48, %v3187_v30  ;;  %v2569_v48 = vld [vmem:[%s3688_s8 + $0x30] sm:$0xff] }
 0xec9   : > { %v2822_v51 = vpop.eup %2821  ;;  %v1745_v52 = vmul.f32 1.442695, %v1742_v49  ;;  %1971 = vmatpush.msrb.mxu2 %v2569_v48  ;;  %v2570_v49 = vld [vmem:[%s3688_s8 + $0x38] sm:$0xff] }
 0xeca   : > { %v2027_v62 = vsel %vm824_vm13, %v2023_v50, -inf  ;;  %v1747_v53 = vsel %vm824_vm13, %v2822_v51, 0.0 }
 0xecb   : > { %2823 = vpow2.f32 %v1745_v52  ;;  %2028 = vmax.xlane.f32.xlu2 %v2027_v62  ;;  %1748 = vadd.xlane.f32.xlu1 %v1747_v53 }
 0xece   : > { %v1895_v23 = vpop.xlane.xlu2 %1894 }
 0xecf   : > { %v1899_v54 = vsub.f32 %v1891_v44, %v1895_v23 }
 0xed1   : > { %v2824_v55 = vpop.eup %2823  ;;  %v1901_v57 = vmul.f32 1.442695, %v1899_v54 }
 0xed2   : > { %v1750_v58 = vsel %vm824_vm13, %v2824_v55, 0.0 }
 0xed3   : > { %2825 = vpow2.f32 %v1901_v57  ;;  %1751 = vadd.xlane.f32.xlu2 %v1750_v58 }
 0xed6   : > { %v1898_v59 = vpop.xlane.xlu0 %1897 }
 0xed7   : > { %v1900_v15 = vsub.f32 %v1892_v34, %v1898_v59 }
 0xed9   : > { %v2826_v30 = vpop.eup %2825  ;;  %v1903_v60 = vmul.f32 1.442695, %v1900_v15  ;;  %v2752_v15 = vld [vmem:[%s3689_s9 + $0x1] ss:$0 sm:$0xff] }
 0xeda   : > { %v1905_v61 = vsel %vm824_vm13, %v2826_v30, 0.0 }
 0xedb   : > { %2827 = vpow2.f32 %v1903_v60  ;;  %1906 = vadd.xlane.f32.xlu1 %v1905_v61 }
 0xee1   : > { %v2828_v63 = vpop.eup %2827 }
 0xee2   : > { %v1908_v20 = vsel %vm824_vm13, %v2828_v63, 0.0 }
 0xee3   : > { %1909 = vadd.xlane.f32.xlu2 %v1908_v20 }
 0xee9   : > { %v2728_v26 = vpop.permute.xlu0 %2727 }
 0xeea   : > { %v2729_v0 = vunpack.i.l.bf16 %v2728_v26  ;;  %v2730_v1 = vunpack.i.h.bf16 %v2728_v26 }
 0xeec   : > { %1783 = vmatpush.msrb.mxu1 %v2729_v0 }
 0xeee   : > { %1784 = vmatpush.msrb.mxu1 %v2730_v1 }
 0xef1   : > { %v2738_v2 = vpop.permute.xlu0 %2737 }
 0xef2   : > { %v2739_v3 = vunpack.i.l.bf16 %v2738_v2  ;;  %v2740_v4 = vunpack.i.h.bf16 %v2738_v2 }
 0xef4   : > { %2072 = vmatpush.msra.mxu3 %v2739_v3  ;;  %2732 = vrot.lane.b32.xlu1 %v3421_v33, %s3760_s22  ;;  %s613_s22 = scalar_lea.vmem %s3761_s26, %s3098_s24  ;;  %s604_s24 = sand.u32 1, %s2917_s30  }
 0xef5   : > { %s605_s23 = scalar_lea.vmem [#allocation2], %s604_s24  ;;  %s2446_s26 = sshll.u32 %s2442_s25, 4  ;;  %s2447_s26 = int_to_ptr.hbm [resolvable:$true] %s2446_s26 }
 0xef6   : > { %2073 = vmatpush.msra.mxu3 %v2740_v4  ;;  %s2444_s3 = sshll.u32 %s605_s23, 4  ;;  %s2877_s27 = sshra.s32 %s2447_s26, 4  ;;  %s2445_s3 = int_to_ptr.vmem [resolvable:$true] %s2444_s3  ;;  %s2878_s27 = int_to_ptr.hbm [resolvable:$true] %s2877_s27 }
 0xef7   : > { %s2879_s2 = scalar_lea.hbm %s2878_s27, 1  ;;  %p2884_p0 = scmp.lt.s32.totalorder %s2878_s27, %s3699_s19 }
 0xef8   : > { %p2880_p11 = scmp.ne.s32.totalorder %s2878_s27, %s2879_s2  ;;  %p2885_p1 = scmp.lt.s32.totalorder %s2883_s20, %s2879_s2 }
 0xefa   : > { %p2881_p12 = pnand %p2880_p11, %p3080_p5  ;;  %p2886_p2 = por %p2885_p1, %p2884_p0 }
 0xefc   : > { %p2882_p13 = pneg %p2881_p12 }
 0xefe   : > { %p2887_p3 = pnand %p2886_p2, %p2882_p13 }
 0xf36   : > { %v2026_v24 = vpop.xlane.xlu1 %2025 }
 0xf37   : > { %v2030_v5 = vsub.f32 %v2022_v42, %v2026_v24 }
 0xf39   : > { %v2032_v6 = vmul.f32 1.442695, %v2030_v5 }
 0xf3b   : > { %2829 = vpow2.f32 %v2032_v6 }
 0xf3e   : > { %v2029_v7 = vpop.xlane.xlu2 %2028  ;;  %v1749_v8 = vpop.xlane.xlu1 %1748 }
 0xf3f   : > { %v2031_v9 = vsub.f32 %v2023_v50, %v2029_v7  ;;  %2831 = vrcp.f32 %v1749_v8 }
 0xf41   : > { %v2830_v10 = vpop.eup %2829  ;;  %v2034_v13 = vmul.f32 1.442695, %v2031_v9 }
 0xf42   : > { %v2036_v14 = vsel %vm824_vm13, %v2830_v10, 0.0 }
 0xf43   : > { %2833 = vpow2.f32 %v2034_v13  ;;  %2037 = vadd.xlane.f32.xlu2 %v2036_v14  ;;  %v2608_v13 = vld [vmem:[%s3692_s12 + $0x30] sm:$0xff]  ;;  %v2607_v14 = vld [vmem:[%s3692_s12 + $0x28] sm:$0xff] }
 0xf45   : > { %v2832_v16 = vpop.eup %2831 }
 0xf46   : > { %v1755_v17 = vmul.f32 %v2832_v16, %v2822_v51  ;;  %v1752_v18 = vpop.xlane.xlu2 %1751  ;;  %v2606_v16 = vld [vmem:[%s3692_s12 + $0x20] sm:$0xff] }
 0xf47   : > { %2835 = vrcp.f32 %v1752_v18 }
 0xf48   : > { %2581 = vmatmul.msk.f32.vlgmr.msrb.gmra.mxu1 %vm824_vm13, %v1755_v17 }
 0xf49   : > { %v2834_v33 = vpop.eup %2833 }
 0xf4a   : > { %v2039_v19 = vsel %vm824_vm13, %v2834_v33, 0.0 }
 0xf4b   : > { %2040 = vadd.xlane.f32.xlu2 %v2039_v19 }
 0xf4d   : > { %v2836_v21 = vpop.eup %2835 }
 0xf4e   : > { %v1756_v22 = vmul.f32 %v2836_v21, %v2824_v55  ;;  %v1907_v25 = vpop.xlane.xlu1 %1906 }
 0xf4f   : > { %2837 = vrcp.f32 %v1907_v25 }
 0xf50   : > { %2582 = vmatmul.msk.f32.gmra.mxu1 %vm824_vm13, %v1756_v22 }
 0xf55   : > { %v2838_v44 = vpop.eup %2837 }
 0xf56   : > { %v1910_v27 = vpop.xlane.xlu2 %1909  ;;  %v1913_v11 = vmul.f32 %v2838_v44, %v2826_v30 }
 0xf57   : > { %2839 = vrcp.f32 %v1910_v27 }
 0xf5d   : > { %v2840_v34 = vpop.eup %2839 }
 0xf5e   : > { %v1914_v12 = vmul.f32 %v2840_v34, %v2828_v63 }
 0xf66   : > { %v2733_v28 = vpop.permute.xlu1 %2732 }
 0xf67   : > { %v2734_v29 = vunpack.i.l.bf16 %v2733_v28  ;;  %v2735_v31 = vunpack.i.h.bf16 %v2733_v28 }
 0xf69   : > { %1941 = vmatpush.msra.mxu1 %v2734_v29 }
 0xf6b   : > { %1942 = vmatpush.msra.mxu1 %v2735_v31 }
 0xf6c   : > { %2591 = vmatmul.msk.f32.vlgmr.msra.gmra.mxu1 %vm824_vm13, %v1913_v11 }
 0xf6d   : > { %2102 = vmatpush.msrb.mxu1 %v2570_v49 }
 0xf74   : > { %2592 = vmatmul.msk.f32.gmra.mxu1 %vm824_vm13, %v1914_v12  ;;  %v2753_v12 = vld [vmem:[%s3690_s10 + $0x1] ss:$0 sm:$0xff] }
 0xfb6   : > { %v2038_v38 = vpop.xlane.xlu2 %2037 }
 0xfb7   : > { %2841 = vrcp.f32 %v2038_v38 }
 0xfbd   : > { %v2842_v39 = vpop.eup %2841 }
 0xfbe   : > { %v2044_v41 = vmul.f32 %v2842_v39, %v2830_v10  ;;  %v2041_v42 = vpop.xlane.xlu2 %2040  ;;  %v2609_v10 = vld [vmem:[%s3692_s12 + $0x38] sm:$0xff] }
 0xfbf   : > { %2843 = vrcp.f32 %v2041_v42 }
 0xfc0   : > { %2599 = vmatmul.msk.f32.vlgmr.msra.gmra.mxu3 %vm824_vm13, %v2044_v41  ;;  %v2754_v41 = vld [vmem:[%s3691_s11 + $0x1] ss:$0 sm:$0xff] }
 0xfc5   : > { %v2844_v43 = vpop.eup %2843  ;;  %v1786_v46 = vpop.f32.mrf.mxu1 }
 0xfc6   : > { %2583 = vmatmul.msk.f32.vlgmr.msra.gmra.mxu2 %vm788_vm11, %v1786_v46  ;;  %v2045_v47 = vmul.f32 %v2844_v43, %v2834_v33 }
 0xfc7   : > { %2207 = vmatpush.msra.mxu2 %v2609_v10 }
 0xfc8   : > { %2600 = vmatmul.msk.f32.gmra.mxu3 %vm824_vm13, %v2045_v47 }
 0xfc9   : > { %2208 = vmatpush.msra.mxu2 %v2608_v13 }
 0xfcb   : > { %2209 = vmatpush.msra.mxu2 %v2607_v14 }
 0xfcd   : > { %v1789_v56 = vpop.f32.mrf.mxu1  ;;  %2210 = vmatpush.msra.mxu2 %v2606_v16 }
 0xfce   : > { %2584 = vmatmul.msk.f32.gmra.mxu2 %vm788_vm11, %v1789_v56 }
 0xfe9   : > { %v1944_v50 = vpop.f32.mrf.mxu1 }
 0xfea   : > { %2593 = vmatmul.msk.f32.vlgmr.msrb.gmra.mxu2 %vm788_vm11, %v1944_v50 }
 0xff1   : > { %v1947_v51 = vpop.f32.mrf.mxu1 }
 0xff2   : > { %2594 = vmatmul.msk.f32.gmra.mxu2 %vm788_vm11, %v1947_v51 }
0x1043   : > { %v2075_v52 = vpop.f32.mrf.mxu3 }
0x1044   : > { %2601 = vmatmul.msk.f32.vlgmr.msrb.gmra.mxu1 %vm788_vm11, %v2075_v52  ;;  %v2630_v52 = vld [vmem:[%s3694_s14 + $0xf8] sm:$0xff] }
0x1045   : > { %2277 = vmatpush.msra.mxu0 %v2630_v52 }
0x1049   : > { %v1815_v53 = vpop.f32.mrf.mxu2 }
0x104a   : > { %v1845_v55 = vadd.f32 %v3478_v35, %v1815_v53  ;;  %v2628_v53 = vld [vmem:[%s3694_s14 + $0xe8] sm:$0xff] }
0x104b   : > { %v2078_v62 = vpop.f32.mrf.mxu3 }
0x104c   : > { %2602 = vmatmul.msk.f32.gmra.mxu1 %vm788_vm11, %v2078_v62  ;;  %v2629_v62 = vld [vmem:[%s3694_s14 + $0xf0] sm:$0xff] }
0x104d   : > { %2278 = vmatpush.msra.mxu0 %v2629_v62 }
0x104f   : > { %2279 = vmatpush.msra.mxu0 %v2628_v53 }
0x1051   : > { %v1818_v23 = vpop.f32.mrf.mxu2 }
0x1052   : > { %v1848_v61 = vadd.f32 %v3480_v36, %v1818_v23  ;;  %v2627_v23 = vld [vmem:[%s3694_s14 + $0xe0] sm:$0xff] }
0x1053   : > { %2280 = vmatpush.msra.mxu0 %v2627_v23 }
0x106d   : > { %v1973_v54 = vpop.f32.mrf.mxu2 }
0x106e   : > { %v1979_v57 = vadd.f32 %v1973_v54, %v1845_v55  ;;  %v2626_v54 = vld [vmem:[%s3694_s14 + $0xd8] sm:$0xff]  ;;  %v2625_v55 = vld [vmem:[%s3694_s14 + $0xd0] sm:$0xff] }
0x106f   : > { %2281 = vmatpush.msra.mxu0 %v2626_v54 }
0x1071   : > { %2282 = vmatpush.msra.mxu0 %v2625_v55 }
0x1075   : > { %v1976_v60 = vpop.f32.mrf.mxu2 }
0x1076   : > { %v1980_v20 = vadd.f32 %v1976_v60, %v1848_v61  ;;  %v2619_v60 = vld [vmem:[%s3694_s14 + $0xa0] sm:$0xff]  ;;  %v2618_v61 = vld [vmem:[%s3694_s14 + $0x98] sm:$0xff] }
0x10c1   : > { %v2104_v58 = vpop.f32.mrf.mxu1 }
0x10c2   : > { %v2110_v59 = vadd.f32 %v2104_v58, %v1979_v57  ;;  %v2624_v57 = vld [vmem:[%s3694_s14 + $0xc8] sm:$0xff]  ;;  %v2623_v58 = vld [vmem:[%s3694_s14 + $0xc0] sm:$0xff] }
0x10c3   : > { %2283 = vmatpush.msra.mxu0 %v2624_v57 }
0x10c4   : > { %v2112_v30 = vadd.f32 %v2110_v59, %v3379_v40  ;;  %v2622_v59 = vld [vmem:[%s3694_s14 + $0xb8] sm:$0xff] }
0x10c5   : > { %2284 = vmatpush.msra.mxu0 %v2623_v58 }
0x10c6   : > { %v3521_v63 = vadd.f32 %v2752_v15, %v2112_v30  ;;  %v2620_v30 = vld [vmem:[%s3694_s14 + $0xa8] sm:$0xff] }
0x10c7   : > { %2285 = vmatpush.msra.mxu0 %v2622_v59 }
0x10c8   : > { %v2125_v26 = vsel %vm679_vm3, %v3521_v63, 0.0 }
0x10c9   : > { %2126 = vadd.xlane.f32.xlu0 %v2125_v26  ;;  %v2107_v35 = vpop.f32.mrf.mxu1  ;;  %v2617_v26 = vld [vmem:[%s3694_s14 + $0x90] sm:$0xff] }
0x10ca   : > { %v2111_v0 = vadd.f32 %v2107_v35, %v1980_v20  ;;  %v2755_v20 = vld [vmem:[%s3693_s13 + $0x1] ss:$0 sm:$0xff] }
0x10cc   : > { %v2113_v1 = vadd.f32 %v2111_v0, %v3384_v45  ;;  %v2616_v0 = vld [vmem:[%s3694_s14 + $0x88] sm:$0xff] }
0x10ce   : > { %v3526_v2 = vadd.f32 %v2752_v15, %v2113_v1  ;;  %v2621_v15 = vld [vmem:[%s3694_s14 + $0xb0] sm:$0xff] }
0x10cf   : > { %2286 = vmatpush.msra.mxu0 %v2621_v15 }
0x10d0   : > { %v2128_v3 = vsel %vm679_vm3, %v3526_v2, 0.0 }
0x10d1   : > { %2129 = vadd.xlane.f32.xlu2 %v2128_v3  ;;  %2287 = vmatpush.msra.mxu0 %v2620_v30  ;;  %v2615_v3 = vld [vmem:[%s3694_s14 + $0x80] sm:$0xff]  ;;  %v2392_v30 = vld [vmem:[%s3698_s18 + $0x18] sm:$0xff] }
0x10d2   : > { %2408 = vmatpush.msra.mxu1 %v2392_v30 }
0x10d3   : > { %2288 = vmatpush.msra.mxu0 %v2619_v60  ;;  %v2391_v60 = vld [vmem:[%s3698_s18 + $0x10] sm:$0xff] }
0x10d4   : > { %2409 = vmatpush.msra.mxu1 %v2391_v60 }
0x10d5   : > { %2289 = vmatpush.msra.mxu0 %v2618_v61 }
0x10d7   : > { %2290 = vmatpush.msra.mxu0 %v2617_v26 }
0x10d9   : > { %2291 = vmatpush.msra.mxu0 %v2616_v0 }
0x10db   : > { %2292 = vmatpush.msra.mxu0 %v2615_v3 }
0x113c   : > { %v2127_v40 = vpop.xlane.xlu0 %2126 }
0x113d   : > { %v2131_v36 = vmul.f32 %v2127_v40, %v3141_v32 }
0x113f   : > { %v2133_v4 = vsub.f32 %v3521_v63, %v2131_v36 }
0x1141   : > { %v2135_v24 = vmul.f32 %v2133_v4, %v2133_v4 }
0x1143   : > { %v2137_v5 = vsel %vm679_vm3, %v2135_v24, 0.0 }
0x1144   : > { %2138 = vadd.xlane.f32.xlu1 %v2137_v5  ;;  %v2130_v6 = vpop.xlane.xlu2 %2129 }
0x1145   : > { %v2132_v7 = vmul.f32 %v2130_v6, %v3141_v32 }
0x1147   : > { %v2134_v45 = vsub.f32 %v3526_v2, %v2132_v7 }
0x1149   : > { %v2136_v8 = vmul.f32 %v2134_v45, %v2134_v45 }
0x114b   : > { %v2140_v9 = vsel %vm679_vm3, %v2136_v8, 0.0 }
0x114c   : > { %2141 = vadd.xlane.f32.xlu2 %v2140_v9 }
0x11b7   : > { %v2139_v17 = vpop.xlane.xlu1 %2138 }
0x11b8   : > { %v2143_v18 = vmul.f32 %v2139_v17, %v3141_v32 }
0x11ba   : > { %v2145_v33 = vadd.f32 1e-05, %v2143_v18 }
0x11bc   : > { %2845 = vrsqrt.f32 %v2145_v33  ;;  %vm2153_vm7 = vweird.f32 %v2145_v33 }
0x11bf   : > { %v2142_v19 = vpop.xlane.xlu2 %2141 }
0x11c0   : > { %v2144_v21 = vmul.f32 %v2142_v19, %v3141_v32 }
0x11c2   : > { %v2846_v22 = vpop.eup %2845  ;;  %v2146_v25 = vadd.f32 1e-05, %v2144_v21 }
0x11c3   : > { %v2148_v27 = vmul.f32 %v2846_v22, %v2145_v33  ;;  %vm2154_vm11 = vweird.f32 %v2846_v22 }
0x11c4   : > { %2847 = vrsqrt.f32 %v2146_v25  ;;  %vm2155_vm8 = vmor %vm2153_vm7, %vm2154_vm11  ;;  %vm2163_vm10 = vweird.f32 %v2146_v25 }
0x11c5   : > { %v2149_v28 = vmul.f32 %v2846_v22, %v2148_v27 }
0x11c7   : > { %v2150_v44 = vmul.f32 0.5, %v2149_v28 }
0x11c9   : > { %v2151_v29 = vsub.f32 1.5, %v2150_v44 }
0x11ca   : > { %v2848_v31 = vpop.eup %2847 }
0x11cb   : > { %v2152_v11 = vmul.f32 %v2846_v22, %v2151_v29  ;;  %v2158_v34 = vmul.f32 %v2848_v31, %v2146_v25  ;;  %vm2164_vm9 = vweird.f32 %v2848_v31 }
0x11cc   : > { %vm2165_vm12 = vmor %vm2163_vm10, %vm2164_vm9 }
0x11cd   : > { %v2156_v37 = vsel %vm2155_vm8, %v2846_v22, %v2152_v11  ;;  %v2159_v38 = vmul.f32 %v2848_v31, %v2158_v34 }
0x11ce   : > { %v2167_v39 = vmul.f32 %v2156_v37, %v2133_v4 }
0x11cf   : > { %v2160_v42 = vmul.f32 0.5, %v2159_v38 }
0x11d0   : > { %v2172_v43 = vmul.f32 %v2753_v12, %v2167_v39 }
0x11d1   : > { %v2161_v46 = vsub.f32 1.5, %v2160_v42 }
0x11d2   : > { %v2177_v47 = vadd.f32 %v2754_v41, %v2172_v43 }
0x11d3   : > { %v2162_v48 = vmul.f32 %v2848_v31, %v2161_v46  ;;  %v2756_v46 = vld [vmem:[%s3695_s15 + $0x1] ss:$0 sm:$0xff] }
0x11d4   : > { %2611 = vmatmul.msk.f32.vlgmr.msra.gmra.mxu2 %vm679_vm3, %v2177_v47 }
0x11d5   : > { %v2166_v56 = vsel %vm2165_vm12, %v2848_v31, %v2162_v48 }
0x11d6   : > { %v2168_v49 = vmul.f32 %v2166_v56, %v2134_v45 }
0x11d8   : > { %v2173_v50 = vmul.f32 %v2753_v12, %v2168_v49 }
0x11da   : > { %v2178_v51 = vadd.f32 %v2754_v41, %v2173_v50 }
0x11dc   : > { %2612 = vmatmul.msk.f32.gmra.mxu2 %vm679_vm3, %v2178_v51 }
0x1257   : > { %v2212_v35 = vpop.f32.mrf.mxu2 }
0x1258   : > { %v2213_v1 = vadd.f32 %v2755_v20, %v2212_v35 }
0x125a   : > { %v2613_v40 = vmul.f32 -1.702, %v2213_v1 }
0x125c   : > { %v2222_v36 = vmul.f32 1.442695, %v2613_v40 }
0x125e   : > { %2849 = vpow2.f32 %v2222_v36 }
0x125f   : > { %v2215_v4 = vpop.f32.mrf.mxu2 }
0x1260   : > { %v2216_v24 = vadd.f32 %v2755_v20, %v2215_v4  ;;  %v2390_v20 = vld [vmem:[%s3698_s18 + $0x8] sm:$0xff] }
0x1261   : > { %2410 = vmatpush.msra.mxu1 %v2390_v20 }
0x1262   : > { %v2614_v5 = vmul.f32 -1.702, %v2216_v24 }
0x1264   : > { %v2850_v6 = vpop.eup %2849  ;;  %v2224_v7 = vmul.f32 1.442695, %v2614_v5 }
0x1265   : > { %v2226_v45 = vadd.f32 1.0, %v2850_v6  ;;  %v2757_v6 = vld [vmem:[%s3696_s16] ss:$0 sm:$0xff] }
0x1266   : > { %2851 = vpow2.f32 %v2224_v7 }
0x1267   : > { %2853 = vrcp.f32 %v2226_v45  ;;  %v2239_v16 = vand.u32 2147483648, %v2226_v45  ;;  %v2237_v18 = vand.u32 2147483647, %v2226_v45  ;;  %vm2233_vm15 = vweird.f32 %v2226_v45 }
0x1269   : > { %v2240_v21 = vor.u32 1.1754944e-38, %v2239_v16  ;;  %vm2238_vm1 = vcmp.eq.f32.partialorder %v2237_v18, 8.507059e+37 }
0x126c   : > { %v2852_v8 = vpop.eup %2851 }
0x126d   : > { %v2854_v9 = vpop.eup %2853  ;;  %v2227_v10 = vadd.f32 1.0, %v2852_v8  ;;  %v2758_v8 = vld [vmem:[%s3697_s17] ss:$0 sm:$0xff] }
0x126e   : > { %v2229_v13 = vmul.f32 %v2854_v9, %v2226_v45  ;;  %vm2234_vm14 = vweird.f32 %v2854_v9 }
0x126f   : > { %2855 = vrcp.f32 %v2227_v10  ;;  %vm2235_vm0 = vmor %vm2233_vm15, %vm2234_vm14  ;;  %v2254_v29 = vand.u32 2147483648, %v2227_v10  ;;  %v2252_v11 = vand.u32 2147483647, %v2227_v10  ;;  %vm2248_vm4 = vweird.f32 %v2227_v10 }
0x1270   : > { %v2230_v14 = vsub.f32 1.0, %v2229_v13  ;;  %vm2417_vm14 = vcmask 122880  }
0x1271   : > { %v2255_v12 = vor.u32 1.1754944e-38, %v2254_v29  ;;  %vm2253_vm6 = vcmp.eq.f32.partialorder %v2252_v11, 8.507059e+37 }
0x1272   : > { %v2231_v17 = vmul.f32 %v2854_v9, %v2230_v14 }
0x1274   : > { %v2232_v33 = vadd.f32 %v2854_v9, %v2231_v17 }
0x1275   : > { %v2856_v19 = vpop.eup %2855 }
0x1276   : > { %v2236_v22 = vsel %vm2235_vm0, %v2854_v9, %v2232_v33  ;;  %v2244_v25 = vmul.f32 %v2856_v19, %v2227_v10  ;;  %vm2249_vm2 = vweird.f32 %v2856_v19 }
0x1277   : > { %v2241_v27 = vsel %vm2238_vm1, %v2240_v21, %v2236_v22  ;;  %vm2250_vm5 = vmor %vm2248_vm4, %vm2249_vm2  ;;  %v2365_v21 = vld [vmem:[%s613_s22] sm:$0x1]  ;;  %s2434_s22 = scalar_lea.sflag [#allocation3], %s604_s24 }
0x1278   : > { %v2258_v28 = vmul.f32 %v2241_v27, %v2213_v1  ;;  %v2245_v44 = vsub.f32 1.0, %v2244_v25  ;;  %v2389_v22 = vld [vmem:[%s3698_s18] sm:$0xff] }
0x1279   : > { %2411 = vmatpush.msra.mxu1 %v2389_v22 }
0x127a   : > { %2293 = vmatmul.f32.vlgmr.msra.gmra.mxu0 %v2258_v28  ;;  %v2246_v31 = vmul.f32 %v2856_v19, %v2245_v44 }
0x127c   : > { %v2247_v34 = vadd.f32 %v2856_v19, %v2246_v31 }
0x127e   : > { %v2251_v37 = vsel %vm2250_vm5, %v2856_v19, %v2247_v34 }
0x127f   : > { %v2256_v38 = vsel %vm2253_vm6, %v2255_v12, %v2251_v37 }
0x1280   : > { %v2259_v39 = vmul.f32 %v2256_v38, %v2216_v24 }
0x1282   : > { %2296 = vmatmul.f32.gmra.mxu0 %v2259_v39 }
0x12f7   : > { %v2294_v41 = vpop.f32.mrf.mxu0 }
0x12f8   : > { %v2300_v48 = vadd.f32 %v2294_v41, %v3521_v63 }
0x12fa   : > { %v2307_v49 = vadd.f32 %v2756_v46, %v2300_v48 }
0x12fc   : > { %v2311_v50 = vsel %vm679_vm3, %v2307_v49, 0.0 }
0x12ff   : > { %v2297_v42 = vpop.f32.mrf.mxu0 }
0x1300   : > { %v2301_v43 = vadd.f32 %v2297_v42, %v3526_v2 }
0x1302   : > { %v2308_v47 = vadd.f32 %v2756_v46, %v2301_v43 }
0x1304   : > { %v2314_v56 = vsel %vm679_vm3, %v2308_v47, 0.0 }
0x1305   : > { %2315 = vadd.xlane.f32.xlu2 %v2314_v56 }
0x130d   : > { %2312 = vadd.xlane.f32.xlu2 %v2311_v50 }
0x1378   : > { %v2316_v51 = vpop.xlane.xlu2 %2315 }
0x1379   : > { %v2318_v52 = vmul.f32 %v2316_v51, %v3141_v32 }
0x137b   : > { %v2320_v62 = vsub.f32 %v2308_v47, %v2318_v52 }
0x137d   : > { %v2322_v53 = vmul.f32 %v2320_v62, %v2320_v62 }
0x137f   : > { %v2326_v2 = vsel %vm679_vm3, %v2322_v53, 0.0 }
0x1380   : > { %2327 = vadd.xlane.f32.xlu2 %v2326_v2  ;;  %v2313_v23 = vpop.xlane.xlu2 %2312 }
0x1381   : > { %v2317_v54 = vmul.f32 %v2313_v23, %v3141_v32 }
0x1383   : > { %v2319_v55 = vsub.f32 %v2307_v49, %v2317_v54 }
0x1385   : > { %v2321_v63 = vmul.f32 %v2319_v55, %v2319_v55 }
0x1387   : > { %v2323_v57 = vsel %vm679_vm3, %v2321_v63, 0.0 }
0x1388   : > { %2324 = vadd.xlane.f32.xlu0 %v2323_v57 }
0x13f3   : > { %v2328_v58 = vpop.xlane.xlu2 %2327 }
0x13f4   : > { %v2330_v59 = vmul.f32 %v2328_v58, %v3141_v32 }
0x13f6   : > { %v2332_v15 = vadd.f32 1e-05, %v2330_v59 }
0x13f8   : > { %2857 = vrsqrt.f32 %v2332_v15  ;;  %vm2349_vm7 = vweird.f32 %v2332_v15 }
0x13fb   : > { %v2325_v61 = vpop.xlane.xlu0 %2324 }
0x13fc   : > { %v2329_v26 = vmul.f32 %v2325_v61, %v3141_v32 }
0x13fe   : > { %v2858_v35 = vpop.eup %2857  ;;  %v2331_v0 = vadd.f32 1e-05, %v2329_v26 }
0x13ff   : > { %v2344_v1 = vmul.f32 %v2858_v35, %v2332_v15  ;;  %vm2350_vm11 = vweird.f32 %v2858_v35 }
0x1400   : > { %2859 = vrsqrt.f32 %v2331_v0  ;;  %vm2351_vm8 = vmor %vm2349_vm7, %vm2350_vm11  ;;  %vm2339_vm10 = vweird.f32 %v2331_v0 }
0x1401   : > { %v2345_v3 = vmul.f32 %v2858_v35, %v2344_v1 }
0x1403   : > { %v2346_v40 = vmul.f32 0.5, %v2345_v3 }
0x1405   : > { %v2347_v36 = vsub.f32 1.5, %v2346_v40 }
0x1406   : > { %v2860_v4 = vpop.eup %2859 }
0x1407   : > { %v2348_v24 = vmul.f32 %v2858_v35, %v2347_v36  ;;  %v2334_v5 = vmul.f32 %v2860_v4, %v2331_v0  ;;  %vm2340_vm9 = vweird.f32 %v2860_v4 }
0x1408   : > { %vm2341_vm12 = vmor %vm2339_vm10, %vm2340_vm9 }
0x1409   : > { %v2352_v32 = vsel %vm2351_vm8, %v2858_v35, %v2348_v24  ;;  %v2335_v7 = vmul.f32 %v2860_v4, %v2334_v5 }
0x140a   : > { %v2354_v45 = vmul.f32 %v2352_v32, %v2320_v62 }
0x140b   : > { %v2336_v9 = vmul.f32 0.5, %v2335_v7 }
0x140c   : > { %v2359_v10 = vmul.f32 %v2757_v6, %v2354_v45 }
0x140d   : > { %v2337_v13 = vsub.f32 1.5, %v2336_v9 }
0x140e   : > { %v2364_v14 = vadd.f32 %v2758_v8, %v2359_v10 }
0x140f   : > { %v2338_v16 = vmul.f32 %v2860_v4, %v2337_v13 }
0x1410   : > { %2383 = vmatpush.msrb.mxu3 %v2364_v14 }
0x1411   : > { %v2342_v17 = vsel %vm2341_vm12, %v2860_v4, %v2338_v16 }
0x1412   : > { %v2353_v18 = vmul.f32 %v2342_v17, %v2319_v55 }
0x1414   : > { %v2358_v33 = vmul.f32 %v2757_v6, %v2353_v18 }
0x1416   : > { %v2363_v19 = vadd.f32 %v2758_v8, %v2358_v33 }
0x1418   : > { %2384 = vmatpush.msrb.mxu3 %v2363_v19 }
0x1419   : > { %2632 = vmatmul.msk.f32.vlgmr.msrb.gmra.mxu3 %vm824_vm13, %v2365_v21 }
0x149c   : > { %v2386_v25 = vpop.f32.mrf.mxu3 }
0x149d   : > { %2633 = vmatmul.msk.f32.vlgmr.msra.gmra.mxu1 %vm679_vm3, %v2386_v25 }
0x151a   : > { %v2413_v27 = vpop.f32.mrf.mxu1 }
0x151b   : > { %v2416_v28 = vmul.f32 %v2413_v27, %v2413_v27 }
0x151d   : > { %v2418_v44 = vsel %vm2417_vm14, %v2416_v28, 0.0 }
0x151e   : > { %2419 = vadd.xlane.f32.xlu2 %v2418_v44 }
0x1591   : > { %v2420_v29 = vpop.xlane.xlu2 %2419 }
0x1592   : > { %2861 = vrsqrt.f32 %v2420_v29  ;;  %vm2427_vm3 = vweird.f32 %v2420_v29 }
0x1598   : > { %v2862_v31 = vpop.eup %2861 }
0x1599   : > { %v2422_v11 = vmul.f32 %v2862_v31, %v2420_v29  ;;  %vm2428_vm13 = vweird.f32 %v2862_v31 }
0x159a   : > { %vm2429_vm15 = vmor %vm2427_vm3, %vm2428_vm13 }
0x159b   : > { %v2423_v34 = vmul.f32 %v2862_v31, %v2422_v11 }
0x159d   : > { %v2424_v12 = vmul.f32 0.5, %v2423_v34 }
0x159f   : > { %v2425_v37 = vsub.f32 1.5, %v2424_v12 }
0x15a1   : > { %v2426_v38 = vmul.f32 %v2862_v31, %v2425_v37 }
0x15a3   : > { %v2430_v39 = vsel %vm2429_vm15, %v2862_v31, %v2426_v38 }
0x15a4   : > { %v2431_v41 = vmul.f32 %v2430_v39, %v2413_v27 }
0x15a6   : > { %2432 = vst.msk [vmem:[%s605_s23] sm:$0x1] %vm2417_vm14, %v2431_v41 }
0x15a7   : > { %2890 = shalt.err (!%p2887_p3)
}
0x15a8   : > { %2646 = dma.vmem_to_hbm [thread:$0]  (%p3080_p5), %s2445_s3, 16, %s2447_s26, %s2434_s22  }
0x15a9 PF: > { %s3763_s24 = sld [smem:[#allocation7_spill]] }
0x15aa   : > { %s3764_s23 = sld [smem:[#allocation5_spill]] }
0x15af   : > { %p2652_p4 = scmp.ge.s32.totalorder %s3763_s24, 2 }
0x15b0   : > { %s2458_s6 = sand.u32 1, %s3764_s23  }
0x15b1   : > { %p2649_p7 = pnand %p2652_p4, %p3084_p6  ;;  %s2459_s1 = scalar_lea.sflag [#allocation3], %s2458_s6 }
0x15b3   : > { %p2650_p8 = pneg %p2649_p7 }
0x15b5   : > { %2908 = dma.done.wait (%p2650_p8), %s2459_s1, 16  }
0x15b6   : > { %2910 = vsyncadd (%p2650_p8), %s2459_s1, 4294967280  ;;  %s3766_s21 = sld [smem:[#allocation8_spill]]  ;;  %s3769_s0 = smov %s2917_s30 }
0x15b7   : > { %s3767_s4 = sld [smem:[#allocation6_spill]] }
0x15b8   : > { %s3768_s20 = sld [smem:[#allocation9_spill]] }
0x15bc   : > { %p29_p9 = scmp.ge.s32.totalorder %s3766_s21, 4  }
0x15bd   : > { %s3770_s30 = smov %s3767_s4 }
0x15be   :  { %31 = sbr.rel (!%p29_p9) target bundleno = 11 (0xb), region = 146 }
0x15c3   :  { %2464 = vsyncpa [#allocation3], 1 }
0x15c4   :  { %2466 = vsyncpa [#allocation3 + $0x1], 1 }

</bundles_post_ra>
